<compile_context>
chip_gen: v7x
topology: tpu7x:2x2x1
jax: 0.10.0
libtpu: 0.0.40
codegen_flags: <defaults>
</compile_context>

<pallas_src>
import jax
import jax.numpy as jnp
from jax.experimental import pallas as pl
from jax.experimental.pallas import tpu as pltpu


def _round_up(x, m):
    return ((x + m - 1) // m) * m


def _cdiv(a, b):
    return -(-a // b)


# ----------------------------------------------------------------------------- kernel
def critic_kernel(obs_ref, acts_ref, w1o_ref, w1a_ref, b1_ref,
                  w2_ref, b2_ref, w3_ref, b3_ref, out_ref):
    # Layer 1: split-K matmul (obs part + acts part), bf16 MXU inputs, f32 acc.
    obs = obs_ref[...].astype(jnp.bfloat16)
    acts = acts_ref[...].astype(jnp.bfloat16)
    h1 = (jnp.dot(obs, w1o_ref[...], preferred_element_type=jnp.float32)
          + jnp.dot(acts, w1a_ref[...], preferred_element_type=jnp.float32)
          + b1_ref[...])
    h1 = jnp.maximum(h1, 0.0).astype(jnp.bfloat16)

    # Layer 2
    h2 = jnp.dot(h1, w2_ref[...], preferred_element_type=jnp.float32) + b2_ref[...]
    h2 = jnp.maximum(h2, 0.0).astype(jnp.bfloat16)

    # Layer 3: (tb, 512) @ (512, 1) -> narrow (tb, 1) store (last dim == full dim).
    out = jnp.dot(h2, w3_ref[...], preferred_element_type=jnp.float32) + b3_ref[...]
    out_ref[...] = out.astype(out_ref.dtype)


# ----------------------------------------------------------------------------- params
def init_params(key, in_dim, h1=1024, h2=512, out_dim=1):
    """PyTorch-style uniform(-1/sqrt(fan_in), 1/sqrt(fan_in)) init (f32 master weights)."""
    ks = jax.random.split(key, 6)

    def lin(kw, kb, fan_in, fan_out):
        bound = 1.0 / jnp.sqrt(jnp.asarray(fan_in, jnp.float32))
        w = jax.random.uniform(kw, (fan_in, fan_out), jnp.float32, -bound, bound)
        b = jax.random.uniform(kb, (fan_out,), jnp.float32, -bound, bound)
        return w, b

    w1, b1 = lin(ks[0], ks[1], in_dim, h1)
    w2, b2 = lin(ks[2], ks[3], h1, h2)
    w3, b3 = lin(ks[4], ks[5], h2, out_dim)
    return (w1, b1, w2, b2, w3, b3)


def prepare_params(params, d_obs):
    """One-time conversion into the kernel layout (call once, cache the result).

    Splits w1 rows into the obs / acts halves of the concat, casts matmul
    weights to bf16 and reshapes biases to (1, H) f32 rows.
    """
    w1, b1, w2, b2, w3, b3 = params
    H1 = w1.shape[1]
    H2 = w2.shape[1]
    prepared = (
        w1[:d_obs].astype(jnp.bfloat16),            # (d_obs, H1)
        w1[d_obs:].astype(jnp.bfloat16),            # (d_act, H1)
        b1.reshape(1, H1).astype(jnp.float32),
        w2.astype(jnp.bfloat16),                    # (H1, H2)
        b2.reshape(1, H2).astype(jnp.float32),
        w3.astype(jnp.bfloat16),                    # (H2, 1)
        b3.reshape(1, 1).astype(jnp.float32),
    )
    return jax.tree_util.tree_map(jax.block_until_ready, prepared)


# ----------------------------------------------------------------------------- forward
def critic_forward(obs, acts, prepared, *, tile_b=512):
    """obs: (B, dim_obs*n_agent), acts: (B, dim_act*n_agent) -> (B, 1) f32."""
    w1o, w1a, b1r, w2b, b2r, w3b, b3r = prepared
    B, d_obs = obs.shape
    _, d_act = acts.shape
    H1 = w1o.shape[1]
    H2 = w2b.shape[1]
    in_dim = d_obs + d_act

    # --- batch tiling: pad only to the f32 sublane (8); >=2 steps for v7x megacore.
    B8 = _round_up(B, 8)
    steps = max(1, _cdiv(B8, tile_b))
    if steps == 1 and B8 >= 16:
        steps = 2
    tb = _round_up(_cdiv(B8, steps), 8)
    B_pad = tb * steps
    if B_pad != B:
        obs = jnp.pad(obs, ((0, B_pad - B), (0, 0)))
        acts = jnp.pad(acts, ((0, B_pad - B), (0, 0)))

    batched = lambda i: (i, 0)   # tiled over the batch axis
    const = lambda i: (0, 0)     # VMEM-resident across all grid steps

    # --- VMEM budget: weights (double-buffered) + I/O buffers + f32/bf16 intermediates.
    weight_bytes = (in_dim * H1 * 2 + H1 * 4 + H1 * H2 * 2 + H2 * 4 + H2 * 2 + 4)
    io_bytes = 2 * tb * in_dim * 4 + 2 * tb * 4
    interm_bytes = tb * H1 * 6 + tb * H2 * 6 + tb * in_dim * 2
    vmem_limit = int(min(48 * 2**20,
                         max(32 * 2**20, 2 * (2 * weight_bytes + io_bytes + interm_bytes))))

    cost = pl.CostEstimate(
        flops=2 * B_pad * (in_dim * H1 + H1 * H2 + H2 * 1),
        transcendentals=0,
        bytes_accessed=B_pad * in_dim * 4 + weight_bytes + B_pad * 4,
    )

    out = pl.pallas_call(
        critic_kernel,
        out_shape=jax.ShapeDtypeStruct((B_pad, 1), jnp.float32),
        grid=(steps,),
        in_specs=[
            pl.BlockSpec((tb, d_obs), batched),
            pl.BlockSpec((tb, d_act), batched),
            pl.BlockSpec((d_obs, H1), const),
            pl.BlockSpec((d_act, H1), const),
            pl.BlockSpec((1, H1), const),
            pl.BlockSpec((H1, H2), const),
            pl.BlockSpec((1, H2), const),
            pl.BlockSpec((H2, 1), const),
            pl.BlockSpec((1, 1), const),
        ],
        out_specs=pl.BlockSpec((tb, 1), batched),
        compiler_params=pltpu.CompilerParams(
            dimension_semantics=("parallel",),
            vmem_limit_bytes=vmem_limit),
        cost_estimate=cost,
    )(obs, acts, w1o, w1a, b1r, w2b, b2r, w3b, b3r)

    # Padded batch rows (bias->ReLU->bias garbage) are discarded here.
    return out[:B]


# ----------------------------------------------------------------------------- reference
def critic_reference(obs, acts, params):
    """Pure-JAX reference using the same bf16-weight / f32-accumulate numerics."""
    w1, b1, w2, b2, w3, b3 = params
    bf = jnp.bfloat16
    x = jnp.concatenate([obs, acts], axis=1)
    h1 = jnp.maximum(
        jnp.dot(x.astype(bf), w1.astype(bf), preferred_element_type=jnp.float32)
        + b1.reshape(1, -1), 0.0)
    h2 = jnp.maximum(
        jnp.dot(h1.astype(bf), w2.astype(bf), preferred_element_type=jnp.float32)
        + b2.reshape(1, -1), 0.0)
    return (jnp.dot(h2.astype(bf), w3.astype(bf), preferred_element_type=jnp.float32)
            + b3.reshape(1, -1))


if __name__ == "__main__":
    # Small shapes consistent with the module.
    n_agent = 2
    dim_observation = 12
    dim_action = 4
    batch = 8
    d_obs_total = dim_observation * n_agent       # 24
    d_act_total = dim_action * n_agent             # 8
    in_dim = d_obs_total + d_act_total              # 32

    key = jax.random.PRNGKey(0)
    k_obs, k_act, k_par = jax.random.split(key, 3)
    obs = jax.random.normal(k_obs, (batch, d_obs_total), jnp.float32)
    acts = jax.random.normal(k_act, (batch, d_act_total), jnp.float32)

    params = init_params(k_par, in_dim)
    prepared = prepare_params(params, d_obs_total)   # one-time layout conversion

    out = critic_forward(obs, acts, prepared)
    out = jax.block_until_ready(out)

    ref = critic_reference(obs, acts, params)
    assert out.shape == (batch, 1)
    assert jnp.allclose(out, ref, atol=1e-2, rtol=1e-2), "mismatch vs reference"

    print("KERNEL_OK")
</pallas_src>

<mosaic_0001>
module attributes {stable_mosaic.version = 11 : i64} {
  func.func @critic_kernel(%arg0: i32, %arg1: memref<8x24xf32, #tpu.memory_space<vmem>>, %arg2: memref<8x8xf32, #tpu.memory_space<vmem>>, %arg3: memref<24x1024xbf16, #tpu.memory_space<vmem>>, %arg4: memref<8x1024xbf16, #tpu.memory_space<vmem>>, %arg5: memref<1x1024xf32, #tpu.memory_space<vmem>>, %arg6: memref<1024x512xbf16, #tpu.memory_space<vmem>>, %arg7: memref<1x512xf32, #tpu.memory_space<vmem>>, %arg8: memref<512x1xbf16, #tpu.memory_space<vmem>>, %arg9: memref<1x1xf32, #tpu.memory_space<vmem>>, %arg10: memref<8x1xf32, #tpu.memory_space<vmem>>) attributes {dimension_semantics = [#tpu.dimension_semantics<parallel>], iteration_bounds = array<i64: 1>, scalar_prefetch = 0 : i64, scratch_operands = 0 : i64, tpu.core_type = #tpu.core_type<tc>, window_params = [{transform_indices = @transform_0, window_bounds = array<i64: 8, 24>}, {transform_indices = @transform_1, window_bounds = array<i64: 8, 8>}, {pipeline_mode = #tpu.pipeline_mode<synchronous>, transform_indices = @transform_2, window_bounds = array<i64: 24, 1024>}, {pipeline_mode = #tpu.pipeline_mode<synchronous>, transform_indices = @transform_3, window_bounds = array<i64: 8, 1024>}, {pipeline_mode = #tpu.pipeline_mode<synchronous>, transform_indices = @transform_4, window_bounds = array<i64: 1, 1024>}, {pipeline_mode = #tpu.pipeline_mode<synchronous>, transform_indices = @transform_5, window_bounds = array<i64: 1024, 512>}, {pipeline_mode = #tpu.pipeline_mode<synchronous>, transform_indices = @transform_6, window_bounds = array<i64: 1, 512>}, {pipeline_mode = #tpu.pipeline_mode<synchronous>, transform_indices = @transform_7, window_bounds = array<i64: 512, 1>}, {pipeline_mode = #tpu.pipeline_mode<synchronous>, transform_indices = @transform_8, window_bounds = array<i64: 1, 1>}, {transform_indices = @transform_9, window_bounds = array<i64: 8, 1>}]} {
    %c0 = arith.constant 0 : index
    %c0_0 = arith.constant 0 : index
    %0 = vector.load %arg1[%c0, %c0_0] : memref<8x24xf32, #tpu.memory_space<vmem>>, vector<8x24xf32>
    %1 = arith.truncf %0 : vector<8x24xf32> to vector<8x24xbf16>
    %c0_1 = arith.constant 0 : index
    %c0_2 = arith.constant 0 : index
    %2 = vector.load %arg2[%c0_1, %c0_2] : memref<8x8xf32, #tpu.memory_space<vmem>>, vector<8x8xf32>
    %3 = arith.truncf %2 : vector<8x8xf32> to vector<8x8xbf16>
    %c0_3 = arith.constant 0 : index
    %c0_4 = arith.constant 0 : index
    %4 = vector.load %arg3[%c0_3, %c0_4] : memref<24x1024xbf16, #tpu.memory_space<vmem>>, vector<24x1024xbf16>
    %cst = arith.constant dense<0.000000e+00> : vector<8x1024xf32>
    %5 = tpu.matmul %1, %4, %cst {dimension_numbers = #tpu.dot_dimension_numbers<[1], [0], [0], [1], [0, 0, 1, 1], [], []>} : vector<8x24xbf16>, vector<24x1024xbf16>, vector<8x1024xf32> -> vector<8x1024xf32>
    %c0_5 = arith.constant 0 : index
    %c0_6 = arith.constant 0 : index
    %6 = vector.load %arg4[%c0_5, %c0_6] : memref<8x1024xbf16, #tpu.memory_space<vmem>>, vector<8x1024xbf16>
    %cst_7 = arith.constant dense<0.000000e+00> : vector<8x1024xf32>
    %7 = tpu.matmul %3, %6, %cst_7 {dimension_numbers = #tpu.dot_dimension_numbers<[1], [0], [0], [1], [0, 0, 1, 1], [], []>} : vector<8x8xbf16>, vector<8x1024xbf16>, vector<8x1024xf32> -> vector<8x1024xf32>
    %8 = arith.addf %5, %7 : vector<8x1024xf32>
    %c0_8 = arith.constant 0 : index
    %c0_9 = arith.constant 0 : index
    %9 = vector.load %arg5[%c0_8, %c0_9] : memref<1x1024xf32, #tpu.memory_space<vmem>>, vector<1x1024xf32>
    %10 = vector.broadcast %9 : vector<1x1024xf32> to vector<8x1024xf32>
    %11 = arith.addf %8, %10 : vector<8x1024xf32>
    %cst_10 = arith.constant 0.000000e+00 : f32
    %12 = vector.broadcast %cst_10 : f32 to vector<8x1024xf32>
    %13 = arith.maximumf %11, %12 : vector<8x1024xf32>
    %14 = arith.truncf %13 : vector<8x1024xf32> to vector<8x1024xbf16>
    %c0_11 = arith.constant 0 : index
    %c0_12 = arith.constant 0 : index
    %15 = vector.load %arg6[%c0_11, %c0_12] : memref<1024x512xbf16, #tpu.memory_space<vmem>>, vector<1024x512xbf16>
    %cst_13 = arith.constant dense<0.000000e+00> : vector<8x512xf32>
    %16 = tpu.matmul %14, %15, %cst_13 {dimension_numbers = #tpu.dot_dimension_numbers<[1], [0], [0], [1], [0, 0, 1, 1], [], []>} : vector<8x1024xbf16>, vector<1024x512xbf16>, vector<8x512xf32> -> vector<8x512xf32>
    %c0_14 = arith.constant 0 : index
    %c0_15 = arith.constant 0 : index
    %17 = vector.load %arg7[%c0_14, %c0_15] : memref<1x512xf32, #tpu.memory_space<vmem>>, vector<1x512xf32>
    %18 = vector.broadcast %17 : vector<1x512xf32> to vector<8x512xf32>
    %19 = arith.addf %16, %18 : vector<8x512xf32>
    %cst_16 = arith.constant 0.000000e+00 : f32
    %20 = vector.broadcast %cst_16 : f32 to vector<8x512xf32>
    %21 = arith.maximumf %19, %20 : vector<8x512xf32>
    %22 = arith.truncf %21 : vector<8x512xf32> to vector<8x512xbf16>
    %c0_17 = arith.constant 0 : index
    %c0_18 = arith.constant 0 : index
    %23 = vector.load %arg8[%c0_17, %c0_18] : memref<512x1xbf16, #tpu.memory_space<vmem>>, vector<512x1xbf16>
    %cst_19 = arith.constant dense<0.000000e+00> : vector<8x1xf32>
    %24 = tpu.matmul %22, %23, %cst_19 {dimension_numbers = #tpu.dot_dimension_numbers<[1], [0], [0], [1], [0, 0, 1, 1], [], []>} : vector<8x512xbf16>, vector<512x1xbf16>, vector<8x1xf32> -> vector<8x1xf32>
    %c0_20 = arith.constant 0 : index
    %c0_21 = arith.constant 0 : index
    %25 = vector.load %arg9[%c0_20, %c0_21] : memref<1x1xf32, #tpu.memory_space<vmem>>, vector<1x1xf32>
    %26 = vector.broadcast %25 : vector<1x1xf32> to vector<8x1xf32>
    %27 = arith.addf %24, %26 : vector<8x1xf32>
    %c0_22 = arith.constant 0 : index
    %c0_23 = arith.constant 0 : index
    %28 = vector.load %arg10[%c0_22, %c0_23] : memref<8x1xf32, #tpu.memory_space<vmem>>, vector<8x1xf32>
    tpu.vector_store %arg10[%c0_22, %c0_23], %27 {strides = array<i32>} : memref<8x1xf32, #tpu.memory_space<vmem>>, vector<8x1xf32>,
    return
  }
  func.func @transform_0(%arg0: i32) -> (i32, i32) {
    %c0_i32 = arith.constant 0 : i32
    %c0_i32_0 = arith.constant 0 : i32
    return %arg0, %c0_i32 : i32, i32
  }
  func.func @transform_1(%arg0: i32) -> (i32, i32) {
    %c0_i32 = arith.constant 0 : i32
    %c0_i32_0 = arith.constant 0 : i32
    return %arg0, %c0_i32 : i32, i32
  }
  func.func @transform_2(%arg0: i32) -> (i32, i32) {
    %c0_i32 = arith.constant 0 : i32
    %c0_i32_0 = arith.constant 0 : i32
    %c0_i32_1 = arith.constant 0 : i32
    return %c0_i32, %c0_i32_0 : i32, i32
  }
  func.func @transform_3(%arg0: i32) -> (i32, i32) {
    %c0_i32 = arith.constant 0 : i32
    %c0_i32_0 = arith.constant 0 : i32
    %c0_i32_1 = arith.constant 0 : i32
    return %c0_i32, %c0_i32_0 : i32, i32
  }
  func.func @transform_4(%arg0: i32) -> (i32, i32) {
    %c0_i32 = arith.constant 0 : i32
    %c0_i32_0 = arith.constant 0 : i32
    %c0_i32_1 = arith.constant 0 : i32
    return %c0_i32, %c0_i32_0 : i32, i32
  }
  func.func @transform_5(%arg0: i32) -> (i32, i32) {
    %c0_i32 = arith.constant 0 : i32
    %c0_i32_0 = arith.constant 0 : i32
    %c0_i32_1 = arith.constant 0 : i32
    return %c0_i32, %c0_i32_0 : i32, i32
  }
  func.func @transform_6(%arg0: i32) -> (i32, i32) {
    %c0_i32 = arith.constant 0 : i32
    %c0_i32_0 = arith.constant 0 : i32
    %c0_i32_1 = arith.constant 0 : i32
    return %c0_i32, %c0_i32_0 : i32, i32
  }
  func.func @transform_7(%arg0: i32) -> (i32, i32) {
    %c0_i32 = arith.constant 0 : i32
    %c0_i32_0 = arith.constant 0 : i32
    %c0_i32_1 = arith.constant 0 : i32
    return %c0_i32, %c0_i32_0 : i32, i32
  }
  func.func @transform_8(%arg0: i32) -> (i32, i32) {
    %c0_i32 = arith.constant 0 : i32
    %c0_i32_0 = arith.constant 0 : i32
    %c0_i32_1 = arith.constant 0 : i32
    return %c0_i32, %c0_i32_0 : i32, i32
  }
  func.func @transform_9(%arg0: i32) -> (i32, i32) {
    %c0_i32 = arith.constant 0 : i32
    %c0_i32_0 = arith.constant 0 : i32
    return %arg0, %c0_i32 : i32, i32
  }
}

</mosaic_0001>

<bundles_post_ra>
// kernel: tpu_custom_call.1
= control target key start
LH: loop header
LB: loop body
LE: loop exit
PB: predicated region body
PF: predicated region fallthrough
CT: control target
= control target key end

     0   :  { %s4018_s0 = inlined_call_operand.vmem [shape: f32[8,24], index: 0, kind: input, shape index: {}]   ;;  %s4019_s1 = inlined_call_operand.vmem [shape: f32[8,8], index: 1, kind: input, shape index: {}]   ;;  %s4020_s2 = inlined_call_operand.vmem [shape: bf16[24,1024], index: 2, kind: input, shape index: {}]   ;;  %s4021_s3 = inlined_call_operand.vmem [shape: bf16[8,1024], index: 3, kind: input, shape index: {}]   ;;  %s4022_s4 = inlined_call_operand.vmem [shape: f32[1,1024], index: 4, kind: input, shape index: {}]   ;;  %s4023_s5 = inlined_call_operand.hbm [shape: bf16[1024,512], index: 5, kind: input, shape index: {}]   ;;  %s4024_s6 = inlined_call_operand.vmem [shape: f32[1,512], index: 6, kind: input, shape index: {}]   ;;  %s4025_s7 = inlined_call_operand.vmem [shape: bf16[512,1], index: 7, kind: input, shape index: {}]   ;;  %s4026_s8 = inlined_call_operand.<no memory space> [shape: f32[1,1], index: 8, kind: input, shape index: {}]   ;;  %s4027_s9 = inlined_call_operand.vmem [shape: f32[8,1], index: 9, kind: output, shape index: {}]  }
   0x1   :  { %v14_v0 = vstv %s4026_s8 }
   0x2   :  { %15 = vst [vmem:[#allocation2] sm:$0x1] %v14_v0 }
   0x3   :  { %16 = vsyncpa [#allocation4], 0  ;;  %s3705_s11 = smov [#allocation3]   ;;  %s3681_s15 = scalar_lea.hbm %s4023_s5, 32768 }
   0x4   :  { %s32_s12 = sshll.u32 %s3705_s11, 4  ;;  %p3682_p0 = scmp.ne.s32.totalorder %s4023_s5, %s3681_s15  ;;  %s33_s12 = int_to_ptr.vmem [resolvable:$true] %s32_s12 }
   0x5   :  { %p3685_p1 = scmp.lt.u32.totalorder %s3681_s15, %s4023_s5 }
   0x7   :  { %p3687_p2 = pnand %p3685_p1, %p3682_p0 }
   0x9   :  { %3690 = shalt.err (!%p3687_p2)
}
   0xa   :  { %s3691_s8 = scalar_lea.vmem %s33_s12, 32768  ;;  %p3696_p4 = scmp.lt.s32.totalorder %s33_s12, %s33_s12 }
   0xb   :  { %p3692_p3 = scmp.ne.s32.totalorder %s33_s12, %s3691_s8  ;;  %p3697_p5 = scmp.lt.s32.totalorder %s3691_s8, %s3691_s8 }
   0xd   :  { %p3698_p6 = por %p3697_p5, %p3696_p4 }
   0xf   :  { %p3699_p7 = pnand %p3698_p6, %p3692_p3 }
  0x11   :  { %3702 = shalt.err (!%p3699_p7)
}
  0x12   :  { %s3706_s20 = smov 256   ;;  %s3707_s21 = smov 16  }
  0x13   :  { %38 = dma.hbm_to_vmem [thread:$0]  %s4023_s5, 32768, %s33_s12, [#allocation4], %s3706_s20, %s3706_s20, %s3707_s21  }
  0x14   :  { %3703 = dma.done.wait [#allocation4], 32768  }
  0x15   :  { %3704 = vsyncadd [#allocation4], 4294934528  ;;  %v3708_v1 = vmov 0   ;;  %v65_v2 = vld [vmem:[%s4021_s3] sm:$0xff]  ;;  %vm93_vm0 = vcmask 1043456   ;;  %v67_v4 = vld [vmem:[%s4021_s3 + $0x10] sm:$0xff] }
  0x16   :  { %150 = vmatprep.mubr.bf16.mxu0 %v3708_v1  ;;  %191 = vmatprep.mubr.bf16.mxu1 %v3708_v1  ;;  %v51_v3 = vld [vmem:[%s4019_s1] sm:$0xff]  ;;  %v2845_v5 = vcombine.high %v65_v2, %v65_v2  ;;  %v2844_v6 = vcombine.low %v65_v2, %v65_v2  ;;  %v2849_v7 = vcombine.high %v67_v4, %v67_v4  ;;  %v66_v13 = vld [vmem:[%s4021_s3 + $0x8] sm:$0xff]  ;;  %v68_v14 = vld [vmem:[%s4021_s3 + $0x18] sm:$0xff]  ;;  %vm89_vm1 = vcmask 64512  }
  0x17   :  { %v2848_v8 = vcombine.low %v67_v4, %v67_v4  ;;  %v53_v9 = vld [vmem:[%s4020_s2] sm:$0xff]  ;;  %v52_v12 = vpack.c.bf16 %v51_v3, %v51_v3  ;;  %v2847_v17 = vcombine.high %v66_v13, %v66_v13  ;;  %v2846_v18 = vcombine.low %v66_v13, %v66_v13  ;;  %v54_v21 = vld [vmem:[%s4020_s2 + $0x8] sm:$0xff]  ;;  %v55_v30 = vld [vmem:[%s4020_s2 + $0x10] sm:$0xff] }
  0x18   :  { %v57_v10 = vld [vmem:[%s4020_s2 + $0x20] sm:$0xff]  ;;  %2852 = vmatprep.subr.msk.bf16.mxu0 %vm93_vm0, %v2845_v5  ;;  %v95_v11 = vsel %vm93_vm0, %v2844_v6, 0  ;;  %v2851_v19 = vcombine.high %v68_v14, %v68_v14  ;;  %v2850_v20 = vcombine.low %v68_v14, %v68_v14  ;;  %v58_v23 = vld [vmem:[%s4020_s2 + $0x28] sm:$0xff]  ;;  %v59_v31 = vld [vmem:[%s4020_s2 + $0x30] sm:$0xff]  ;;  %vm342_vm2 = vcmask 195584  }
  0x19   :  { %119 = vmatpush1.bf16.msra.mxu0 %v95_v11  ;;  %v107_v15 = vsel %vm93_vm0, %v2848_v8, 0  ;;  %v2861_v16 = vcombine.high %v53_v9, %v57_v10  ;;  %2854 = vmatprep.subr.msk.bf16.mxu1 %vm93_vm0, %v2847_v17  ;;  %v101_v22 = vsel %vm93_vm0, %v2846_v18, 0  ;;  %v61_v24 = vld [vmem:[%s4020_s2 + $0x40] sm:$0xff]  ;;  %v2863_v26 = vcombine.high %v54_v21, %v58_v23  ;;  %v62_v32 = vld [vmem:[%s4020_s2 + $0x48] sm:$0xff]  ;;  %v63_v36 = vld [vmem:[%s4020_s2 + $0x50] sm:$0xff] }
  0x1a   :  { %2856 = vmatprep.subr.msk.bf16.mxu0 %vm93_vm0, %v2849_v7  ;;  %160 = vmatpush1.bf16.msra.mxu1 %v101_v22  ;;  %v113_v25 = vsel %vm93_vm0, %v2850_v20, 0  ;;  %v2860_v27 = vcombine.low %v53_v9, %v57_v10  ;;  %v2869_v28 = vcombine.high %v61_v24, %v61_v24  ;;  %v2868_v29 = vcombine.low %v61_v24, %v61_v24  ;;  %v49_v33 = vld [vmem:[%s4018_s0] sm:$0xff]  ;;  %v56_v40 = vld [vmem:[%s4020_s2 + $0x18] sm:$0xff] }
  0x1b   :  { %2858 = vmatprep.subr.msk.bf16.mxu1 %vm93_vm0, %v2851_v19  ;;  %v2865_v35 = vcombine.high %v55_v30, %v59_v31  ;;  %v2862_v37 = vcombine.low %v54_v21, %v58_v23  ;;  %v2871_v38 = vcombine.high %v62_v32, %v62_v32  ;;  %v2870_v39 = vcombine.low %v62_v32, %v62_v32  ;;  %v60_v42 = vld [vmem:[%s4020_s2 + $0x38] sm:$0xff]  ;;  %v3265_v54 = vld [vmem:[#allocation3] ss:$16 sps:$4 sm:$0xff]  }
  0x1c   :  { %2853 = vmatmul.mubr.msk.bf16.vlgmr.msra.gmra.mrb[0].mxu0 %vm89_vm1, %v52_v12  ;;  %v347_v34 = vsel %vm93_vm0, %v2868_v29, 0  ;;  %v50_v41 = vpack.c.bf16 %v49_v33, %v49_v33  ;;  %v2864_v43 = vcombine.low %v55_v30, %v59_v31  ;;  %v2873_v44 = vcombine.high %v63_v36, %v63_v36  ;;  %v64_v48 = vld [vmem:[%s4020_s2 + $0x58] sm:$0xff]  ;;  %v3271_v59 = vld [vmem:[#allocation3 + $0x20] ss:$16 sps:$4 sm:$0xff]  }
  0x1d   :  { %201 = vmatpush1.bf16.msra.mxu0 %v107_v15  ;;  %232 = vmatprep.mubr.bf16.mxu0 %v3708_v1  ;;  %v2872_v45 = vcombine.low %v63_v36, %v63_v36  ;;  %v353_v46 = vsel %vm93_vm0, %v2870_v39, 0  ;;  %v2867_v47 = vcombine.high %v56_v40, %v60_v42  ;;  %v2866_v50 = vcombine.low %v56_v40, %v60_v42  ;;  %v3267_v53 = vld [vmem:[#allocation3 + $0x4] ss:$16 sps:$4 sm:$0xff]   ;;  %v3270_v57 = vld [vmem:[#allocation3 + $0xc] ss:$16 sps:$4 sm:$0xff]  }
  0x1e   :  { %370 = vmatprep.subr.bf16.mxu0 %v2861_v16  ;;  %2855 = vmatmul.mubr.msk.bf16.vlgmr.msra.gmra.mrb[0].mxu1 %vm89_vm1, %v52_v12  ;;  %v2875_v51 = vcombine.high %v64_v48, %v64_v48  ;;  %v2874_v52 = vcombine.low %v64_v48, %v64_v48  ;;  %v3273_v55 = vld [vmem:[#allocation3 + $0x24] ss:$16 sps:$4 sm:$0xff]   ;;  %v3268_v58 = vld [vmem:[#allocation3 + $0x8] ss:$16 sps:$4 sm:$0xff]   ;;  %v3276_v60 = vld [vmem:[#allocation3 + $0x2c] ss:$16 sps:$4 sm:$0xff]   ;;  %v536_v48 = vlaneseq }
  0x1f   :  { %242 = vmatpush1.bf16.msra.mxu1 %v113_v25  ;;  %273 = vmatprep.mubr.bf16.mxu1 %v3708_v1  ;;  %v359_v49 = vsel %vm93_vm0, %v2872_v45, 0  ;;  %v3279_v61 = vld [vmem:[#allocation3 + $0x44] ss:$16 sps:$4 sm:$0xff]   ;;  %v3277_v62 = vld [vmem:[#allocation3 + $0x40] ss:$16 sps:$4 sm:$0xff]   ;;  %vm2837_vm3 = vcmask 7168  }
  0x20   :  { %411 = vmatprep.subr.bf16.mxu1 %v2863_v26  ;;  %v365_v56 = vsel %vm93_vm0, %v2874_v52, 0  ;;  %v3274_v63 = vld [vmem:[#allocation3 + $0x28] ss:$16 sps:$4 sm:$0xff]   ;;  %v3285_v0 = vld [vmem:[#allocation3 + $0x64] ss:$16 sps:$4 sm:$0xff]  }
  0x21   :  { %v3283_v2 = vld [vmem:[#allocation3 + $0x60] ss:$16 sps:$4 sm:$0xff]   ;;  %v3280_v3 = vld [vmem:[#allocation3 + $0x48] ss:$16 sps:$4 sm:$0xff]   ;;  %v3291_v4 = vld [vmem:[#allocation3 + $0x84] ss:$16 sps:$4 sm:$0xff]  }
  0x22   :  { %v3288_v5 = vld [vmem:[#allocation3 + $0x6c] ss:$16 sps:$4 sm:$0xff]   ;;  %v3289_v6 = vld [vmem:[#allocation3 + $0x80] ss:$16 sps:$4 sm:$0xff]   ;;  %v3286_v7 = vld [vmem:[#allocation3 + $0x68] ss:$16 sps:$4 sm:$0xff]  }
  0x23   :  { %v3297_v8 = vld [vmem:[#allocation3 + $0xa4] ss:$16 sps:$4 sm:$0xff]   ;;  %v3294_v9 = vld [vmem:[#allocation3 + $0x8c] ss:$16 sps:$4 sm:$0xff]   ;;  %v3295_v10 = vld [vmem:[#allocation3 + $0xa0] ss:$16 sps:$4 sm:$0xff]  }
  0x24   :  { %2857 = vmatmul.mubr.msk.bf16.vlgmr.msra.gmra.mrb[4].mxu0 %vm89_vm1, %v52_v12  ;;  %v3292_v11 = vld [vmem:[#allocation3 + $0x88] ss:$16 sps:$4 sm:$0xff]   ;;  %v3300_v13 = vld [vmem:[#allocation3 + $0xac] ss:$16 sps:$4 sm:$0xff]   ;;  %v3301_v14 = vld [vmem:[#allocation3 + $0xc0] ss:$16 sps:$4 sm:$0xff]  }
  0x25   :  { %371 = vmatpush1.bf16.msra.mxu0 %v2860_v27  ;;  %402 = vmatprep.mubr.bf16.mxu0 %v3708_v1  ;;  %v3298_v15 = vld [vmem:[#allocation3 + $0xa8] ss:$16 sps:$4 sm:$0xff]   ;;  %v3309_v16 = vld [vmem:[#allocation3 + $0xe4] ss:$16 sps:$4 sm:$0xff]   ;;  %v3306_v17 = vld [vmem:[#allocation3 + $0xcc] ss:$16 sps:$4 sm:$0xff]  }
  0x26   :  { %2876 = vmatprep.subr.msk.bf16.mxu0 %vm93_vm0, %v2869_v28  ;;  %2859 = vmatmul.mubr.msk.bf16.vlgmr.msra.gmra.mrb[4].mxu1 %vm89_vm1, %v52_v12  ;;  %v3303_v12 = vld [vmem:[#allocation3 + $0xc4] ss:$16 sps:$4 sm:$0xff]   ;;  %v3307_v18 = vld [vmem:[#allocation3 + $0xe0] ss:$16 sps:$4 sm:$0xff]   ;;  %v3304_v19 = vld [vmem:[#allocation3 + $0xc8] ss:$16 sps:$4 sm:$0xff]  }
  0x27   :  { %412 = vmatpush1.bf16.msra.mxu1 %v2862_v37  ;;  %443 = vmatprep.mubr.bf16.mxu1 %v3708_v1  ;;  %v3315_v20 = vld [vmem:[#allocation3 + $0x104] ss:$16 sps:$4 sm:$0xff]   ;;  %v3312_v21 = vld [vmem:[#allocation3 + $0xec] ss:$16 sps:$4 sm:$0xff]   ;;  %v3313_v22 = vld [vmem:[#allocation3 + $0x100] ss:$16 sps:$4 sm:$0xff]  }
  0x28   :  { %2878 = vmatprep.subr.msk.bf16.mxu1 %vm93_vm0, %v2871_v38  ;;  %v3310_v23 = vld [vmem:[#allocation3 + $0xe8] ss:$16 sps:$4 sm:$0xff]   ;;  %v3321_v24 = vld [vmem:[#allocation3 + $0x124] ss:$16 sps:$4 sm:$0xff]   ;;  %v3318_v25 = vld [vmem:[#allocation3 + $0x10c] ss:$16 sps:$4 sm:$0xff]  }
  0x29   :  { %373 = vmatpush1.bf16.msra.mxu0 %v347_v34  ;;  %v3319_v26 = vld [vmem:[#allocation3 + $0x120] ss:$16 sps:$4 sm:$0xff]   ;;  %v3316_v27 = vld [vmem:[#allocation3 + $0x108] ss:$16 sps:$4 sm:$0xff]   ;;  %v3324_v28 = vld [vmem:[#allocation3 + $0x12c] ss:$16 sps:$4 sm:$0xff]  }
  0x2a   :  { %452 = vmatprep.subr.bf16.mxu0 %v2865_v35  ;;  %v3322_v29 = vld [vmem:[#allocation3 + $0x128] ss:$16 sps:$4 sm:$0xff]   ;;  %v3327_v30 = vld [vmem:[#allocation3 + $0x144] ss:$16 sps:$4 sm:$0xff]   ;;  %v3330_v31 = vld [vmem:[#allocation3 + $0x14c] ss:$16 sps:$4 sm:$0xff]  }
  0x2b   :  { %414 = vmatpush1.bf16.msra.mxu1 %v353_v46  ;;  %v3325_v32 = vld [vmem:[#allocation3 + $0x140] ss:$16 sps:$4 sm:$0xff]   ;;  %v3328_v33 = vld [vmem:[#allocation3 + $0x148] ss:$16 sps:$4 sm:$0xff]   ;;  %v3333_v35 = vld [vmem:[#allocation3 + $0x164] ss:$16 sps:$4 sm:$0xff]  }
  0x2c   :  { %2877 = vmatmul.mubr.msk.bf16.vlgmr.msra.gmra.mrb[8].mxu0 %vm342_vm2, %v50_v41  ;;  %493 = vmatprep.subr.bf16.mxu1 %v2867_v47  ;;  %v3331_v34 = vld [vmem:[#allocation3 + $0x160] ss:$16 sps:$4 sm:$0xff]   ;;  %v3334_v36 = vld [vmem:[#allocation3 + $0x168] ss:$16 sps:$4 sm:$0xff]   ;;  %v3336_v37 = vld [vmem:[#allocation3 + $0x16c] ss:$16 sps:$4 sm:$0xff]  }
  0x2d   :  { %453 = vmatpush1.bf16.msra.mxu0 %v2864_v43  ;;  %484 = vmatprep.mubr.bf16.mxu0 %v3708_v1  ;;  %v3339_v38 = vld [vmem:[#allocation3 + $0x184] ss:$16 sps:$4 sm:$0xff]   ;;  %v3342_v39 = vld [vmem:[#allocation3 + $0x18c] ss:$16 sps:$4 sm:$0xff]   ;;  %v3337_v40 = vld [vmem:[#allocation3 + $0x180] ss:$16 sps:$4 sm:$0xff]  }
  0x2e   :  { %2880 = vmatprep.subr.msk.bf16.mxu0 %vm93_vm0, %v2873_v44  ;;  %2879 = vmatmul.mubr.msk.bf16.vlgmr.msra.gmra.mrb[8].mxu1 %vm342_vm2, %v50_v41  ;;  %v3343_v42 = vld [vmem:[#allocation3 + $0x1a0] ss:$16 sps:$4 sm:$0xff]   ;;  %v3345_v43 = vld [vmem:[#allocation3 + $0x1a4] ss:$16 sps:$4 sm:$0xff]   ;;  %v3346_v44 = vld [vmem:[#allocation3 + $0x1a8] ss:$16 sps:$4 sm:$0xff]  }
  0x2f   :  { %494 = vmatpush1.bf16.msra.mxu1 %v2866_v50  ;;  %525 = vmatprep.mubr.bf16.mxu1 %v3708_v1  ;;  %v3282_v1 = vld [vmem:[#allocation3 + $0x4c] ss:$16 sps:$4 sm:$0xff]   ;;  %v3351_v46 = vld [vmem:[#allocation3 + $0x1c4] ss:$16 sps:$4 sm:$0xff]   ;;  %v3352_v50 = vld [vmem:[#allocation3 + $0x1c8] ss:$16 sps:$4 sm:$0xff]  }
  0x30   :  { %2882 = vmatprep.subr.msk.bf16.mxu1 %vm93_vm0, %v2875_v51  ;;  %v3348_v45 = vld [vmem:[#allocation3 + $0x1ac] ss:$16 sps:$4 sm:$0xff]   ;;  %v3357_v51 = vld [vmem:[#allocation3 + $0x1e4] ss:$16 sps:$4 sm:$0xff]  }
  0x31   :  { %455 = vmatpush1.bf16.msra.mxu0 %v359_v49  ;;  %v3354_v47 = vld [vmem:[#allocation3 + $0x1cc] ss:$16 sps:$4 sm:$0xff]   ;;  %v3349_v49 = vld [vmem:[#allocation3 + $0x1c0] ss:$16 sps:$4 sm:$0xff]  }
  0x32   :  { %2158 = vmatprep.subr.bf16.mxu0 %v3267_v53  ;;  %v3360_v52 = vld [vmem:[#allocation3 + $0x1ec] ss:$16 sps:$4 sm:$0xff]   ;;  %v3860_v53 = vshrl.u32 %v536_v48, 7 }
  0x33   :  { %496 = vmatpush1.bf16.msra.mxu1 %v365_v56 }
  0x34   :  { %2881 = vmatmul.mubr.msk.bf16.vlgmr.msra.gmra.mrb[12].mxu0 %vm342_vm2, %v50_v41  ;;  %2322 = vmatprep.subr.bf16.mxu1 %v3270_v57  ;;  %v554_v56 = vsub.s32 4, %v3860_v53  ;;  %v534_v57 = vld [vmem:[%s4022_s4] sm:$0xff] }
  0x35   :  { %2159 = vmatpush1.bf16.msra.mxu0 %v3265_v54  ;;  %v3355_v54 = vld [vmem:[#allocation3 + $0x1e0] ss:$16 sps:$4 sm:$0xff]  }
  0x36   :  { %2160 = vmatprep.subr.bf16.mxu0 %v3273_v55  ;;  %2883 = vmatmul.mubr.msk.bf16.vlgmr.msra.gmra.mrb[12].mxu1 %vm342_vm2, %v50_v41  ;;  %v3340_v41 = vld [vmem:[#allocation3 + $0x188] ss:$16 sps:$4 sm:$0xff]  }
  0x37   :  { %2323 = vmatpush1.bf16.msra.mxu1 %v3268_v58  ;;  %v3358_v55 = vld [vmem:[#allocation3 + $0x1e8] ss:$16 sps:$4 sm:$0xff]   ;;  %v558_v58 = vsub.s32 5, %v3860_v53 }
  0x38   :  { %2324 = vmatprep.subr.bf16.mxu1 %v3276_v60  ;;  %v3366_v60 = vld [vmem:[#allocation3 + $0x20c] ss:$16 sps:$4 sm:$0xff]  }
  0x39   :  { %2161 = vmatpush1.bf16.msra.mxu0 %v3271_v59  ;;  %v3363_v59 = vld [vmem:[#allocation3 + $0x204] ss:$16 sps:$4 sm:$0xff]  }
  0x3a   :  { %2162 = vmatprep.subr.bf16.mxu0 %v3279_v61  ;;  %v3867_v61 = vrot.slane %v534_v57, %v554_v56 }
  0x3b   :  { %2325 = vmatpush1.bf16.msra.mxu1 %v3274_v63  ;;  %v562_v63 = vsub.s32 6, %v3860_v53 }
  0x3c   :  { %2326 = vmatprep.subr.bf16.mxu1 %v3282_v1 }
  0x3d   :  { %2163 = vmatpush1.bf16.msra.mxu0 %v3277_v62  ;;  %v3869_v62 = vrot.slane %v534_v57, %v558_v58  ;;  %v3873_v1 = vrot.slane %v534_v57, %v562_v63  ;;  %v3367_v63 = vld [vmem:[#allocation3 + $0x220] ss:$16 sps:$4 sm:$0xff]  }
  0x3e   :  { %2164 = vmatprep.subr.bf16.mxu0 %v3285_v0  ;;  %v566_v0 = vsub.s32 7, %v3860_v53 }
  0x3f   :  { %2327 = vmatpush1.bf16.msra.mxu1 %v3280_v3 }
  0x40   :  { %2328 = vmatprep.subr.bf16.mxu1 %v3288_v5 }
  0x41   :  { %2165 = vmatpush1.bf16.msra.mxu0 %v3283_v2  ;;  %v3875_v2 = vrot.slane %v534_v57, %v566_v0  ;;  %v3370_v0 = vld [vmem:[#allocation3 + $0x228] ss:$16 sps:$4 sm:$0xff]  }
  0x42   :  { %2166 = vmatprep.subr.bf16.mxu0 %v3291_v4 }
  0x43   :  { %2329 = vmatpush1.bf16.msra.mxu1 %v3286_v7 }
  0x44   :  { %2330 = vmatprep.subr.bf16.mxu1 %v3294_v9 }
  0x45   :  { %2167 = vmatpush1.bf16.msra.mxu0 %v3289_v6 }
  0x46   :  { %2168 = vmatprep.subr.bf16.mxu0 %v3297_v8 }
  0x47   :  { %2331 = vmatpush1.bf16.msra.mxu1 %v3292_v11 }
  0x48   :  { %2332 = vmatprep.subr.bf16.mxu1 %v3300_v13 }
  0x49   :  { %2169 = vmatpush1.bf16.msra.mxu0 %v3295_v10 }
  0x4a   :  { %2170 = vmatprep.subr.bf16.mxu0 %v3303_v12 }
  0x4b   :  { %2333 = vmatpush1.bf16.msra.mxu1 %v3298_v15  ;;  %v538_v15 = vsub.s32 0, %v3860_v53 }
  0x4c   :  { %2334 = vmatprep.subr.bf16.mxu1 %v3306_v17 }
  0x4d   :  { %2171 = vmatpush1.bf16.msra.mxu0 %v3301_v14 }
  0x4e   :  { %2172 = vmatprep.subr.bf16.mxu0 %v3309_v16  ;;  %v542_v16 = vsub.s32 1, %v3860_v53 }
  0x4f   :  { %2335 = vmatpush1.bf16.msra.mxu1 %v3304_v19  ;;  %v539_v19 = vrot.slane %v534_v57, %v538_v15 }
  0x50   :  { %2336 = vmatprep.subr.bf16.mxu1 %v3312_v21 }
  0x51   :  { %2173 = vmatpush1.bf16.msra.mxu0 %v3307_v18 }
  0x52   :  { %2174 = vmatprep.subr.bf16.mxu0 %v3315_v20 }
  0x53   :  { %2337 = vmatpush1.bf16.msra.mxu1 %v3310_v23 }
  0x54   :  { %2338 = vmatprep.subr.bf16.mxu1 %v3318_v25 }
  0x55   :  { %2175 = vmatpush1.bf16.msra.mxu0 %v3313_v22  ;;  %v543_v22 = vrot.slane %v534_v57, %v542_v16 }
  0x56   :  { %2176 = vmatprep.subr.bf16.mxu0 %v3321_v24  ;;  %v546_v24 = vsub.s32 2, %v3860_v53 }
  0x57   :  { %2339 = vmatpush1.bf16.msra.mxu1 %v3316_v27  ;;  %v550_v27 = vsub.s32 3, %v3860_v53 }
  0x58   :  { %2340 = vmatprep.subr.bf16.mxu1 %v3324_v28 }
  0x59   :  { %2177 = vmatpush1.bf16.msra.mxu0 %v3319_v26 }
  0x5a   :  { %2178 = vmatprep.subr.bf16.mxu0 %v3327_v30 }
  0x5b   :  { %2341 = vmatpush1.bf16.msra.mxu1 %v3322_v29 }
  0x5c   :  { %2342 = vmatprep.subr.bf16.mxu1 %v3330_v31 }
  0x5d   :  { %2179 = vmatpush1.bf16.msra.mxu0 %v3325_v32 }
  0x5e   :  { %2180 = vmatprep.subr.bf16.mxu0 %v3333_v35 }
  0x5f   :  { %2343 = vmatpush1.bf16.msra.mxu1 %v3328_v33  ;;  %v547_v33 = vrot.slane %v534_v57, %v546_v24 }
  0x60   :  { %2344 = vmatprep.subr.bf16.mxu1 %v3336_v37 }
  0x61   :  { %2181 = vmatpush1.bf16.msra.mxu0 %v3331_v34 }
  0x62   :  { %2182 = vmatprep.subr.bf16.mxu0 %v3339_v38 }
  0x63   :  { %2345 = vmatpush1.bf16.msra.mxu1 %v3334_v36  ;;  %v551_v36 = vrot.slane %v534_v57, %v550_v27 }
  0x64   :  { %2346 = vmatprep.subr.bf16.mxu1 %v3342_v39 }
  0x65   :  { %2183 = vmatpush1.bf16.msra.mxu0 %v3337_v40 }
  0x66   :  { %2184 = vmatprep.subr.bf16.mxu0 %v3345_v43 }
  0x67   :  { %2347 = vmatpush1.bf16.msra.mxu1 %v3340_v41 }
  0x68   :  { %2348 = vmatprep.subr.bf16.mxu1 %v3348_v45  ;;  %v3364_v45 = vld [vmem:[#allocation3 + $0x208] ss:$16 sps:$4 sm:$0xff]  }
  0x69   :  { %2185 = vmatpush1.bf16.msra.mxu0 %v3343_v42 }
  0x6a   :  { %2186 = vmatprep.subr.bf16.mxu0 %v3351_v46 }
  0x6b   :  { %2349 = vmatpush1.bf16.msra.mxu1 %v3346_v44  ;;  %v3361_v44 = vld [vmem:[#allocation3 + $0x200] ss:$16 sps:$4 sm:$0xff]  }
  0x6c   :  { %2350 = vmatprep.subr.bf16.mxu1 %v3354_v47 }
  0x6d   :  { %2187 = vmatpush1.bf16.msra.mxu0 %v3349_v49 }
  0x6e   :  { %2188 = vmatprep.subr.bf16.mxu0 %v3357_v51  ;;  %v3369_v51 = vld [vmem:[#allocation3 + $0x224] ss:$16 sps:$4 sm:$0xff]  }
  0x6f   :  { %2351 = vmatpush1.bf16.msra.mxu1 %v3352_v50 }
  0x70   :  { %2352 = vmatprep.subr.bf16.mxu1 %v3360_v52  ;;  %v3372_v52 = vld [vmem:[#allocation3 + $0x22c] ss:$16 sps:$4 sm:$0xff]  }
  0x71   :  { %2189 = vmatpush1.bf16.msra.mxu0 %v3355_v54 }
  0x72   :  { %2199 = vmatprep.subr.bf16.mxu0 %v3363_v59 }
  0x73   :  { %2353 = vmatpush1.bf16.msra.mxu1 %v3358_v55 }
  0x74   :  { %2363 = vmatprep.subr.bf16.mxu1 %v3366_v60 }
  0xef   :  { %v152_v3 = vpop.f32.mrb[0].mxu0 }
  0xf0   :  { %v154_v4 = vpop.f32.mrb[1].mxu0 }
  0xf1   :  { %v156_v5 = vpop.f32.mrb[2].mxu0  ;;  %v193_v7 = vpop.f32.mrb[0].mxu1 }
  0xf2   :  { %v157_v6 = vpop.f32.mrb[3].mxu0  ;;  %v195_v8 = vpop.f32.mrb[1].mxu1 }
  0xf3   :  { %v197_v9 = vpop.f32.mrb[2].mxu1 }
  0xf4   :  { %v198_v11 = vpop.f32.mrb[3].mxu1 }
  0xf7   :  { %v234_v10 = vpop.f32.mrb[4].mxu0 }
  0xf8   :  { %v236_v12 = vpop.f32.mrb[5].mxu0 }
  0xf9   :  { %v238_v13 = vpop.f32.mrb[6].mxu0  ;;  %v275_v17 = vpop.f32.mrb[4].mxu1 }
  0xfa   :  { %v239_v14 = vpop.f32.mrb[7].mxu0  ;;  %v277_v18 = vpop.f32.mrb[5].mxu1  ;;  %v3381_v13 = vld [vmem:[#allocation3 + $0x264] ss:$16 sps:$4 sm:$0xff]  }
  0xfb   :  { %v279_v20 = vpop.f32.mrb[6].mxu1  ;;  %v3384_v14 = vld [vmem:[#allocation3 + $0x26c] ss:$16 sps:$4 sm:$0xff]  }
  0xfc   :  { %v280_v23 = vpop.f32.mrb[7].mxu1  ;;  %v3387_v20 = vld [vmem:[#allocation3 + $0x284] ss:$16 sps:$4 sm:$0xff]  }
  0xfd   :  { %v3393_v23 = vld [vmem:[#allocation3 + $0x2a4] ss:$16 sps:$4 sm:$0xff]  }
  0xff   :  { %v404_v21 = vpop.f32.mrb[8].mxu0 }
 0x100   :  { %v405_v25 = vadd.f32 %v404_v21, %v152_v3  ;;  %v406_v26 = vpop.f32.mrb[9].mxu0  ;;  %v3375_v3 = vld [vmem:[#allocation3 + $0x244] ss:$16 sps:$4 sm:$0xff]   ;;  %v3390_v21 = vld [vmem:[#allocation3 + $0x28c] ss:$16 sps:$4 sm:$0xff]  }
 0x101   :  { %v407_v28 = vadd.f32 %v406_v26, %v154_v4  ;;  %v408_v29 = vpop.f32.mrb[10].mxu0  ;;  %v445_v35 = vpop.f32.mrb[8].mxu1  ;;  %v3378_v4 = vld [vmem:[#allocation3 + $0x24c] ss:$16 sps:$4 sm:$0xff]   ;;  %v3394_v26 = vld [vmem:[#allocation3 + $0x2a8] ss:$16 sps:$4 sm:$0xff]  }
 0x102   :  { %v576_v30 = vadd.f32 %v539_v19, %v405_v25  ;;  %v409_v31 = vpop.f32.mrb[11].mxu0  ;;  %v446_v38 = vadd.f32 %v445_v35, %v193_v7  ;;  %v447_v39 = vpop.f32.mrb[9].mxu1  ;;  %v3396_v25 = vld [vmem:[#allocation3 + $0x2ac] ss:$16 sps:$4 sm:$0xff]   ;;  %v3406_v35 = vld [vmem:[#allocation3 + $0x2e8] ss:$16 sps:$4 sm:$0xff]  }
 0x103   :  { %v577_v32 = vadd.f32 %v543_v22, %v407_v28  ;;  %v448_v40 = vadd.f32 %v447_v39, %v195_v8  ;;  %v449_v41 = vpop.f32.mrb[10].mxu1  ;;  %v3388_v22 = vld [vmem:[#allocation3 + $0x288] ss:$16 sps:$4 sm:$0xff]   ;;  %v3399_v28 = vld [vmem:[#allocation3 + $0x2c4] ss:$16 sps:$4 sm:$0xff]  }
 0x104   :  { %v584_v34 = vmax.f32 %v576_v30, 0.0  ;;  %v3889_v46 = vadd.f32 %v547_v33, %v446_v38  ;;  %v450_v47 = vpop.f32.mrb[11].mxu1  ;;  %v3402_v29 = vld [vmem:[#allocation3 + $0x2cc] ss:$16 sps:$4 sm:$0xff]   ;;  %v3397_v30 = vld [vmem:[#allocation3 + $0x2c0] ss:$16 sps:$4 sm:$0xff]  }
 0x105   :  { %v585_v37 = vmax.f32 %v577_v32, 0.0  ;;  %v579_v54 = vadd.f32 %v551_v36, %v448_v40  ;;  %v3400_v31 = vld [vmem:[#allocation3 + $0x2c8] ss:$16 sps:$4 sm:$0xff]   ;;  %v3405_v32 = vld [vmem:[#allocation3 + $0x2e4] ss:$16 sps:$4 sm:$0xff]  }
 0x106   :  { %v592_v48 = vpack.c.bf16 %v584_v34, %v584_v34  ;;  %v3408_v33 = vld [vmem:[#allocation3 + $0x2ec] ss:$16 sps:$4 sm:$0xff]   ;;  %v3403_v34 = vld [vmem:[#allocation3 + $0x2e0] ss:$16 sps:$4 sm:$0xff]   ;;  %v3411_v36 = vld [vmem:[#allocation3 + $0x304] ss:$16 sps:$4 sm:$0xff]  }
 0x107   :  { %v593_v42 = vpack.c.bf16 %v585_v37, %v585_v37  ;;  %v486_v43 = vpop.f32.mrb[12].mxu0  ;;  %v587_v58 = vmax.f32 %v579_v54, 0.0  ;;  %v3414_v37 = vld [vmem:[#allocation3 + $0x30c] ss:$16 sps:$4 sm:$0xff]   ;;  %v3409_v38 = vld [vmem:[#allocation3 + $0x300] ss:$16 sps:$4 sm:$0xff]  }
 0x108   :  { %v487_v49 = vadd.f32 %v486_v43, %v234_v10  ;;  %v488_v50 = vpop.f32.mrb[13].mxu0  ;;  %v3376_v10 = vld [vmem:[#allocation3 + $0x248] ss:$16 sps:$4 sm:$0xff]   ;;  %v3417_v40 = vld [vmem:[#allocation3 + $0x324] ss:$16 sps:$4 sm:$0xff]  }
 0x109   :  { %v489_v55 = vadd.f32 %v488_v50, %v236_v12  ;;  %2190 = vmatprep.mubr.bf16.mxu0 %v593_v42  ;;  %2354 = vmatprep.mubr.bf16.mxu1 %v593_v42  ;;  %v490_v56 = vpop.f32.mrb[14].mxu0  ;;  %v595_v5 = vpack.c.bf16 %v587_v58, %v587_v58  ;;  %v527_v6 = vpop.f32.mrb[12].mxu1  ;;  %v3412_v39 = vld [vmem:[#allocation3 + $0x308] ss:$16 sps:$4 sm:$0xff]   ;;  %v3420_v41 = vld [vmem:[#allocation3 + $0x32c] ss:$16 sps:$4 sm:$0xff]  }
 0x10a   :  { %v3892_v57 = vadd.f32 %v3867_v61, %v487_v49  ;;  %2191 = vmatmul.mubr.bf16.vlgmr.msra.gmra.mrb[16].mxu0 %v592_v48  ;;  %2355 = vmatmul.mubr.bf16.vlgmr.msra.gmra.mrb[16].mxu1 %v592_v48  ;;  %v491_v59 = vpop.f32.mrb[15].mxu0  ;;  %v528_v7 = vadd.f32 %v527_v6, %v275_v17  ;;  %v529_v61 = vpop.f32.mrb[13].mxu1  ;;  %v3379_v17 = vld [vmem:[#allocation3 + $0x260] ss:$16 sps:$4 sm:$0xff]   ;;  %v3418_v43 = vld [vmem:[#allocation3 + $0x328] ss:$16 sps:$4 sm:$0xff]  }
 0x10b   :  { %v3895_v60 = vadd.f32 %v3869_v62, %v489_v55  ;;  %2200 = vmatpush1.bf16.msra.mxu0 %v3361_v44  ;;  %2364 = vmatpush1.bf16.msra.mxu1 %v3364_v45  ;;  %v530_v8 = vadd.f32 %v529_v61, %v277_v18  ;;  %v531_v9 = vpop.f32.mrb[14].mxu1  ;;  %v3373_v62 = vld [vmem:[#allocation3 + $0x240] ss:$16 sps:$4 sm:$0xff]   ;;  %v3382_v18 = vld [vmem:[#allocation3 + $0x268] ss:$16 sps:$4 sm:$0xff]  }
 0x10c   :  { %2201 = vmatprep.subr.bf16.mxu0 %v3369_v51  ;;  %2365 = vmatprep.subr.bf16.mxu1 %v3372_v52  ;;  %v3898_v11 = vadd.f32 %v3873_v1, %v528_v7  ;;  %v532_v12 = vpop.f32.mrb[15].mxu1  ;;  %v3385_v1 = vld [vmem:[#allocation3 + $0x280] ss:$16 sps:$4 sm:$0xff]   ;;  %v3423_v44 = vld [vmem:[#allocation3 + $0x344] ss:$16 sps:$4 sm:$0xff]  }
 0x10d   :  { %2231 = vmatprep.mubr.bf16.mxu0 %v595_v5  ;;  %2395 = vmatprep.mubr.bf16.mxu1 %v595_v5  ;;  %v3901_v19 = vadd.f32 %v3875_v2, %v530_v8  ;;  %v3391_v2 = vld [vmem:[#allocation3 + $0x2a0] ss:$16 sps:$4 sm:$0xff]   ;;  %v3426_v45 = vld [vmem:[#allocation3 + $0x34c] ss:$16 sps:$4 sm:$0xff]   ;;  %v3424_v48 = vld [vmem:[#allocation3 + $0x348] ss:$16 sps:$4 sm:$0xff]  }
 0x10e   :  { %v3415_v42 = vld [vmem:[#allocation3 + $0x320] ss:$16 sps:$4 sm:$0xff]   ;;  %v3429_v49 = vld [vmem:[#allocation3 + $0x364] ss:$16 sps:$4 sm:$0xff]   ;;  %v3432_v50 = vld [vmem:[#allocation3 + $0x36c] ss:$16 sps:$4 sm:$0xff]  }
 0x10f   :  { %2202 = vmatpush1.bf16.msra.mxu0 %v3367_v63  ;;  %2366 = vmatpush1.bf16.msra.mxu1 %v3370_v0  ;;  %v3421_v47 = vld [vmem:[#allocation3 + $0x340] ss:$16 sps:$4 sm:$0xff]   ;;  %v3430_v52 = vld [vmem:[#allocation3 + $0x368] ss:$16 sps:$4 sm:$0xff]   ;;  %v3435_v54 = vld [vmem:[#allocation3 + $0x384] ss:$16 sps:$4 sm:$0xff]  }
 0x110   :  { %2203 = vmatprep.subr.bf16.mxu0 %v3375_v3  ;;  %2367 = vmatprep.subr.bf16.mxu1 %v3378_v4  ;;  %v3427_v51 = vld [vmem:[#allocation3 + $0x360] ss:$16 sps:$4 sm:$0xff]   ;;  %v3438_v55 = vld [vmem:[#allocation3 + $0x38c] ss:$16 sps:$4 sm:$0xff]   ;;  %v3436_v58 = vld [vmem:[#allocation3 + $0x388] ss:$16 sps:$4 sm:$0xff]  }
 0x111   :  { %v3433_v56 = vld [vmem:[#allocation3 + $0x380] ss:$16 sps:$4 sm:$0xff]   ;;  %v3441_v59 = vld [vmem:[#allocation3 + $0x3a4] ss:$16 sps:$4 sm:$0xff]   ;;  %v3444_v63 = vld [vmem:[#allocation3 + $0x3ac] ss:$16 sps:$4 sm:$0xff]  }
 0x112   :  { %v3439_v0 = vld [vmem:[#allocation3 + $0x3a0] ss:$16 sps:$4 sm:$0xff]   ;;  %v3442_v3 = vld [vmem:[#allocation3 + $0x3a8] ss:$16 sps:$4 sm:$0xff]   ;;  %v3447_v4 = vld [vmem:[#allocation3 + $0x3c4] ss:$16 sps:$4 sm:$0xff]  }
 0x113   :  { %2204 = vmatpush1.bf16.msra.mxu0 %v3373_v62  ;;  %2368 = vmatpush1.bf16.msra.mxu1 %v3376_v10  ;;  %v3450_v5 = vld [vmem:[#allocation3 + $0x3cc] ss:$16 sps:$4 sm:$0xff]   ;;  %v3445_v6 = vld [vmem:[#allocation3 + $0x3c0] ss:$16 sps:$4 sm:$0xff]   ;;  %v3448_v7 = vld [vmem:[#allocation3 + $0x3c8] ss:$16 sps:$4 sm:$0xff]  }
 0x114   :  { %2205 = vmatprep.subr.bf16.mxu0 %v3381_v13  ;;  %2369 = vmatprep.subr.bf16.mxu1 %v3384_v14  ;;  %v3453_v61 = vld [vmem:[#allocation3 + $0x3e4] ss:$16 sps:$4 sm:$0xff]   ;;  %v3456_v8 = vld [vmem:[#allocation3 + $0x3ec] ss:$16 sps:$4 sm:$0xff]   ;;  %v3451_v9 = vld [vmem:[#allocation3 + $0x3e0] ss:$16 sps:$4 sm:$0xff]  }
 0x115   :  { %v3454_v62 = vld [vmem:[#allocation3 + $0x3e8] ss:$16 sps:$4 sm:$0xff]   ;;  %v586_v10 = vmax.f32 %v3889_v46, 0.0  ;;  %v3459_v12 = vld [vmem:[#allocation3 + $0x404] ss:$16 sps:$4 sm:$0xff]   ;;  %v589_v14 = vmax.f32 %v3895_v60, 0.0 }
 0x116   :  { %v3462_v13 = vld [vmem:[#allocation3 + $0x40c] ss:$16 sps:$4 sm:$0xff]   ;;  %v3463_v46 = vld [vmem:[#allocation3 + $0x420] ss:$16 sps:$4 sm:$0xff]  }
 0x117   :  { %2206 = vmatpush1.bf16.msra.mxu0 %v3379_v17  ;;  %2370 = vmatpush1.bf16.msra.mxu1 %v3382_v18  ;;  %v3457_v17 = vld [vmem:[#allocation3 + $0x400] ss:$16 sps:$4 sm:$0xff]   ;;  %v594_v18 = vpack.c.bf16 %v586_v10, %v586_v10  ;;  %v3474_v60 = vld [vmem:[#allocation3 + $0x44c] ss:$16 sps:$4 sm:$0xff]   ;;  %v3537_v10 = vld [vmem:[#allocation3 + $0x5a4] ss:$16 sps:$4 sm:$0xff]  }
 0x118   :  { %2207 = vmatprep.subr.bf16.mxu0 %v3387_v20  ;;  %2371 = vmatprep.subr.bf16.mxu1 %v3390_v21  ;;  %v3460_v20 = vld [vmem:[#allocation3 + $0x408] ss:$16 sps:$4 sm:$0xff]   ;;  %v597_v21 = vpack.c.bf16 %v589_v14, %v589_v14 }
 0x119   :  { %v3538_v14 = vld [vmem:[#allocation3 + $0x5a8] ss:$16 sps:$4 sm:$0xff]  }
 0x11b   :  { %2208 = vmatpush1.bf16.msra.mxu0 %v3385_v1  ;;  %2372 = vmatpush1.bf16.msra.mxu1 %v3388_v22  ;;  %v3465_v1 = vld [vmem:[#allocation3 + $0x424] ss:$16 sps:$4 sm:$0xff]   ;;  %v3468_v22 = vld [vmem:[#allocation3 + $0x42c] ss:$16 sps:$4 sm:$0xff]  }
 0x11c   :  { %2209 = vmatprep.subr.bf16.mxu0 %v3393_v23  ;;  %2373 = vmatprep.subr.bf16.mxu1 %v3396_v25  ;;  %v3466_v23 = vld [vmem:[#allocation3 + $0x428] ss:$16 sps:$4 sm:$0xff]   ;;  %v3471_v25 = vld [vmem:[#allocation3 + $0x444] ss:$16 sps:$4 sm:$0xff]  }
 0x11f   :  { %2210 = vmatpush1.bf16.msra.mxu0 %v3391_v2  ;;  %2374 = vmatpush1.bf16.msra.mxu1 %v3394_v26  ;;  %v3469_v2 = vld [vmem:[#allocation3 + $0x440] ss:$16 sps:$4 sm:$0xff]   ;;  %v3472_v26 = vld [vmem:[#allocation3 + $0x448] ss:$16 sps:$4 sm:$0xff]  }
 0x120   :  { %2211 = vmatprep.subr.bf16.mxu0 %v3399_v28  ;;  %2375 = vmatprep.subr.bf16.mxu1 %v3402_v29  ;;  %v3477_v28 = vld [vmem:[#allocation3 + $0x464] ss:$16 sps:$4 sm:$0xff]   ;;  %v3480_v29 = vld [vmem:[#allocation3 + $0x46c] ss:$16 sps:$4 sm:$0xff]  }
 0x123   :  { %2212 = vmatpush1.bf16.msra.mxu0 %v3397_v30  ;;  %2376 = vmatpush1.bf16.msra.mxu1 %v3400_v31  ;;  %v3475_v30 = vld [vmem:[#allocation3 + $0x460] ss:$16 sps:$4 sm:$0xff]   ;;  %v3478_v31 = vld [vmem:[#allocation3 + $0x468] ss:$16 sps:$4 sm:$0xff]  }
 0x124   :  { %2213 = vmatprep.subr.bf16.mxu0 %v3405_v32  ;;  %2377 = vmatprep.subr.bf16.mxu1 %v3408_v33  ;;  %v3483_v32 = vld [vmem:[#allocation3 + $0x484] ss:$16 sps:$4 sm:$0xff]   ;;  %v3486_v33 = vld [vmem:[#allocation3 + $0x48c] ss:$16 sps:$4 sm:$0xff]  }
 0x127   :  { %2214 = vmatpush1.bf16.msra.mxu0 %v3403_v34  ;;  %2378 = vmatpush1.bf16.msra.mxu1 %v3406_v35  ;;  %v3481_v34 = vld [vmem:[#allocation3 + $0x480] ss:$16 sps:$4 sm:$0xff]   ;;  %v3484_v35 = vld [vmem:[#allocation3 + $0x488] ss:$16 sps:$4 sm:$0xff]  }
 0x128   :  { %2215 = vmatprep.subr.bf16.mxu0 %v3411_v36  ;;  %2379 = vmatprep.subr.bf16.mxu1 %v3414_v37  ;;  %v3489_v36 = vld [vmem:[#allocation3 + $0x4a4] ss:$16 sps:$4 sm:$0xff]   ;;  %v3492_v37 = vld [vmem:[#allocation3 + $0x4ac] ss:$16 sps:$4 sm:$0xff]  }
 0x12b   :  { %2216 = vmatpush1.bf16.msra.mxu0 %v3409_v38  ;;  %2380 = vmatpush1.bf16.msra.mxu1 %v3412_v39  ;;  %v3487_v38 = vld [vmem:[#allocation3 + $0x4a0] ss:$16 sps:$4 sm:$0xff]   ;;  %v3490_v39 = vld [vmem:[#allocation3 + $0x4a8] ss:$16 sps:$4 sm:$0xff]  }
 0x12c   :  { %2217 = vmatprep.subr.bf16.mxu0 %v3417_v40  ;;  %2381 = vmatprep.subr.bf16.mxu1 %v3420_v41  ;;  %v3495_v40 = vld [vmem:[#allocation3 + $0x4c4] ss:$16 sps:$4 sm:$0xff]   ;;  %v3498_v41 = vld [vmem:[#allocation3 + $0x4cc] ss:$16 sps:$4 sm:$0xff]  }
 0x12f   :  { %2218 = vmatpush1.bf16.msra.mxu0 %v3415_v42  ;;  %2382 = vmatpush1.bf16.msra.mxu1 %v3418_v43  ;;  %v3493_v42 = vld [vmem:[#allocation3 + $0x4c0] ss:$16 sps:$4 sm:$0xff]   ;;  %v3496_v43 = vld [vmem:[#allocation3 + $0x4c8] ss:$16 sps:$4 sm:$0xff]  }
 0x130   :  { %2219 = vmatprep.subr.bf16.mxu0 %v3423_v44  ;;  %2383 = vmatprep.subr.bf16.mxu1 %v3426_v45  ;;  %v3501_v44 = vld [vmem:[#allocation3 + $0x4e4] ss:$16 sps:$4 sm:$0xff]   ;;  %v3504_v45 = vld [vmem:[#allocation3 + $0x4ec] ss:$16 sps:$4 sm:$0xff]  }
 0x133   :  { %2220 = vmatpush1.bf16.msra.mxu0 %v3421_v47  ;;  %2384 = vmatpush1.bf16.msra.mxu1 %v3424_v48  ;;  %v3499_v47 = vld [vmem:[#allocation3 + $0x4e0] ss:$16 sps:$4 sm:$0xff]   ;;  %v3502_v48 = vld [vmem:[#allocation3 + $0x4e8] ss:$16 sps:$4 sm:$0xff]  }
 0x134   :  { %2221 = vmatprep.subr.bf16.mxu0 %v3429_v49  ;;  %2385 = vmatprep.subr.bf16.mxu1 %v3432_v50  ;;  %v3507_v49 = vld [vmem:[#allocation3 + $0x504] ss:$16 sps:$4 sm:$0xff]   ;;  %v3510_v50 = vld [vmem:[#allocation3 + $0x50c] ss:$16 sps:$4 sm:$0xff]  }
 0x137   :  { %2222 = vmatpush1.bf16.msra.mxu0 %v3427_v51  ;;  %2386 = vmatpush1.bf16.msra.mxu1 %v3430_v52  ;;  %v3505_v51 = vld [vmem:[#allocation3 + $0x500] ss:$16 sps:$4 sm:$0xff]   ;;  %v3508_v52 = vld [vmem:[#allocation3 + $0x508] ss:$16 sps:$4 sm:$0xff]  }
 0x138   :  { %2223 = vmatprep.subr.bf16.mxu0 %v3435_v54  ;;  %2387 = vmatprep.subr.bf16.mxu1 %v3438_v55  ;;  %v3513_v54 = vld [vmem:[#allocation3 + $0x524] ss:$16 sps:$4 sm:$0xff]   ;;  %v3516_v55 = vld [vmem:[#allocation3 + $0x52c] ss:$16 sps:$4 sm:$0xff]  }
 0x13b   :  { %2224 = vmatpush1.bf16.msra.mxu0 %v3433_v56  ;;  %2388 = vmatpush1.bf16.msra.mxu1 %v3436_v58  ;;  %v3511_v56 = vld [vmem:[#allocation3 + $0x520] ss:$16 sps:$4 sm:$0xff]   ;;  %v3514_v58 = vld [vmem:[#allocation3 + $0x528] ss:$16 sps:$4 sm:$0xff]  }
 0x13c   :  { %2225 = vmatprep.subr.bf16.mxu0 %v3441_v59  ;;  %2389 = vmatprep.subr.bf16.mxu1 %v3444_v63  ;;  %v3519_v59 = vld [vmem:[#allocation3 + $0x544] ss:$16 sps:$4 sm:$0xff]   ;;  %v3522_v63 = vld [vmem:[#allocation3 + $0x54c] ss:$16 sps:$4 sm:$0xff]  }
 0x13f   :  { %2226 = vmatpush1.bf16.msra.mxu0 %v3439_v0  ;;  %2390 = vmatpush1.bf16.msra.mxu1 %v3442_v3  ;;  %v3517_v0 = vld [vmem:[#allocation3 + $0x540] ss:$16 sps:$4 sm:$0xff]   ;;  %v3520_v3 = vld [vmem:[#allocation3 + $0x548] ss:$16 sps:$4 sm:$0xff]  }
 0x140   :  { %2227 = vmatprep.subr.bf16.mxu0 %v3447_v4  ;;  %2391 = vmatprep.subr.bf16.mxu1 %v3450_v5  ;;  %v3525_v4 = vld [vmem:[#allocation3 + $0x564] ss:$16 sps:$4 sm:$0xff]   ;;  %v3528_v5 = vld [vmem:[#allocation3 + $0x56c] ss:$16 sps:$4 sm:$0xff]  }
 0x143   :  { %2228 = vmatpush1.bf16.msra.mxu0 %v3445_v6  ;;  %2392 = vmatpush1.bf16.msra.mxu1 %v3448_v7  ;;  %v3523_v6 = vld [vmem:[#allocation3 + $0x560] ss:$16 sps:$4 sm:$0xff]   ;;  %v3526_v7 = vld [vmem:[#allocation3 + $0x568] ss:$16 sps:$4 sm:$0xff]  }
 0x144   :  { %2229 = vmatprep.subr.bf16.mxu0 %v3453_v61  ;;  %2393 = vmatprep.subr.bf16.mxu1 %v3456_v8  ;;  %v3531_v61 = vld [vmem:[#allocation3 + $0x584] ss:$16 sps:$4 sm:$0xff]   ;;  %v3534_v8 = vld [vmem:[#allocation3 + $0x58c] ss:$16 sps:$4 sm:$0xff]  }
 0x147   :  { %2230 = vmatpush1.bf16.msra.mxu0 %v3451_v9  ;;  %2394 = vmatpush1.bf16.msra.mxu1 %v3454_v62  ;;  %v3529_v9 = vld [vmem:[#allocation3 + $0x580] ss:$16 sps:$4 sm:$0xff]   ;;  %v3532_v62 = vld [vmem:[#allocation3 + $0x588] ss:$16 sps:$4 sm:$0xff]  }
 0x148   :  { %2240 = vmatprep.subr.bf16.mxu0 %v3459_v12  ;;  %2404 = vmatprep.subr.bf16.mxu1 %v3462_v13  ;;  %v3540_v12 = vld [vmem:[#allocation3 + $0x5ac] ss:$16 sps:$4 sm:$0xff]   ;;  %v3535_v13 = vld [vmem:[#allocation3 + $0x5a0] ss:$16 sps:$4 sm:$0xff]  }
 0x14a   :  { %2232 = vmatmul.mubr.bf16.vlgmr.msra.gmra.mrb[16].mxu0 %v594_v18  ;;  %2396 = vmatmul.mubr.bf16.vlgmr.msra.gmra.mrb[16].mxu1 %v594_v18  ;;  %v3546_v18 = vld [vmem:[#allocation3 + $0x5cc] ss:$16 sps:$4 sm:$0xff]  }
 0x14b   :  { %2241 = vmatpush1.bf16.msra.mxu0 %v3457_v17  ;;  %2272 = vmatprep.mubr.bf16.mxu0 %v597_v21  ;;  %v3543_v17 = vld [vmem:[#allocation3 + $0x5c4] ss:$16 sps:$4 sm:$0xff]  }
 0x14c   :  { %2405 = vmatpush1.bf16.msra.mxu1 %v3460_v20  ;;  %2436 = vmatprep.mubr.bf16.mxu1 %v597_v21  ;;  %v3541_v20 = vld [vmem:[#allocation3 + $0x5c0] ss:$16 sps:$4 sm:$0xff]   ;;  %v3544_v21 = vld [vmem:[#allocation3 + $0x5c8] ss:$16 sps:$4 sm:$0xff]  }
 0x14d   :  { %2242 = vmatprep.subr.bf16.mxu0 %v3465_v1  ;;  %2406 = vmatprep.subr.bf16.mxu1 %v3468_v22  ;;  %v3549_v1 = vld [vmem:[#allocation3 + $0x5e4] ss:$16 sps:$4 sm:$0xff]   ;;  %v3552_v22 = vld [vmem:[#allocation3 + $0x5ec] ss:$16 sps:$4 sm:$0xff]  }
 0x14f   :  { %2243 = vmatpush1.bf16.msra.mxu0 %v3463_v46  ;;  %v3547_v46 = vld [vmem:[#allocation3 + $0x5e0] ss:$16 sps:$4 sm:$0xff]  }
 0x150   :  { %2407 = vmatpush1.bf16.msra.mxu1 %v3466_v23  ;;  %2244 = vmatprep.subr.bf16.mxu0 %v3471_v25  ;;  %v588_v23 = vmax.f32 %v3892_v57, 0.0  ;;  %v3550_v25 = vld [vmem:[#allocation3 + $0x5e8] ss:$16 sps:$4 sm:$0xff]   ;;  %v3559_v57 = vld [vmem:[#allocation3 + $0x620] ss:$16 sps:$4 sm:$0xff]  }
 0x151   :  { %2408 = vmatprep.subr.bf16.mxu1 %v3474_v60  ;;  %v3555_v60 = vld [vmem:[#allocation3 + $0x604] ss:$16 sps:$4 sm:$0xff]  }
 0x153   :  { %2245 = vmatpush1.bf16.msra.mxu0 %v3469_v2  ;;  %v3558_v2 = vld [vmem:[#allocation3 + $0x60c] ss:$16 sps:$4 sm:$0xff]  }
 0x154   :  { %2409 = vmatpush1.bf16.msra.mxu1 %v3472_v26  ;;  %2246 = vmatprep.subr.bf16.mxu0 %v3477_v28  ;;  %v591_v26 = vmax.f32 %v3901_v19, 0.0  ;;  %v3553_v28 = vld [vmem:[#allocation3 + $0x600] ss:$16 sps:$4 sm:$0xff]   ;;  %v3570_v19 = vld [vmem:[#allocation3 + $0x64c] ss:$16 sps:$4 sm:$0xff]  }
 0x155   :  { %2410 = vmatprep.subr.bf16.mxu1 %v3480_v29  ;;  %v596_v29 = vpack.c.bf16 %v588_v23, %v588_v23  ;;  %v3636_v23 = vld [vmem:[#allocation3 + $0x7ac] ss:$16 sps:$4 sm:$0xff]  }
 0x157   :  { %2247 = vmatpush1.bf16.msra.mxu0 %v3475_v30  ;;  %v3556_v30 = vld [vmem:[#allocation3 + $0x608] ss:$16 sps:$4 sm:$0xff]  }
 0x158   :  { %2411 = vmatpush1.bf16.msra.mxu1 %v3478_v31  ;;  %2248 = vmatprep.subr.bf16.mxu0 %v3483_v32  ;;  %v3561_v31 = vld [vmem:[#allocation3 + $0x624] ss:$16 sps:$4 sm:$0xff]   ;;  %v599_v32 = vpack.c.bf16 %v591_v26, %v591_v26  ;;  %v3642_v26 = vld [vmem:[#allocation3 + $0x7cc] ss:$16 sps:$4 sm:$0xff]  }
 0x159   :  { %2412 = vmatprep.subr.bf16.mxu1 %v3486_v33  ;;  %v3564_v33 = vld [vmem:[#allocation3 + $0x62c] ss:$16 sps:$4 sm:$0xff]  }
 0x15b   :  { %2249 = vmatpush1.bf16.msra.mxu0 %v3481_v34  ;;  %v3562_v34 = vld [vmem:[#allocation3 + $0x628] ss:$16 sps:$4 sm:$0xff]  }
 0x15c   :  { %2413 = vmatpush1.bf16.msra.mxu1 %v3484_v35  ;;  %2250 = vmatprep.subr.bf16.mxu0 %v3489_v36  ;;  %v3567_v35 = vld [vmem:[#allocation3 + $0x644] ss:$16 sps:$4 sm:$0xff]   ;;  %v3565_v36 = vld [vmem:[#allocation3 + $0x640] ss:$16 sps:$4 sm:$0xff]  }
 0x15d   :  { %2414 = vmatprep.subr.bf16.mxu1 %v3492_v37  ;;  %v3568_v37 = vld [vmem:[#allocation3 + $0x648] ss:$16 sps:$4 sm:$0xff]  }
 0x15f   :  { %2251 = vmatpush1.bf16.msra.mxu0 %v3487_v38  ;;  %v3573_v38 = vld [vmem:[#allocation3 + $0x664] ss:$16 sps:$4 sm:$0xff]  }
 0x160   :  { %2415 = vmatpush1.bf16.msra.mxu1 %v3490_v39  ;;  %2252 = vmatprep.subr.bf16.mxu0 %v3495_v40  ;;  %v3576_v39 = vld [vmem:[#allocation3 + $0x66c] ss:$16 sps:$4 sm:$0xff]   ;;  %v3571_v40 = vld [vmem:[#allocation3 + $0x660] ss:$16 sps:$4 sm:$0xff]  }
 0x161   :  { %2416 = vmatprep.subr.bf16.mxu1 %v3498_v41  ;;  %v3574_v41 = vld [vmem:[#allocation3 + $0x668] ss:$16 sps:$4 sm:$0xff]  }
 0x163   :  { %2253 = vmatpush1.bf16.msra.mxu0 %v3493_v42  ;;  %v3579_v42 = vld [vmem:[#allocation3 + $0x684] ss:$16 sps:$4 sm:$0xff]  }
 0x164   :  { %2417 = vmatpush1.bf16.msra.mxu1 %v3496_v43  ;;  %2254 = vmatprep.subr.bf16.mxu0 %v3501_v44  ;;  %v3582_v43 = vld [vmem:[#allocation3 + $0x68c] ss:$16 sps:$4 sm:$0xff]   ;;  %v3577_v44 = vld [vmem:[#allocation3 + $0x680] ss:$16 sps:$4 sm:$0xff]  }
 0x165   :  { %2418 = vmatprep.subr.bf16.mxu1 %v3504_v45  ;;  %v3580_v45 = vld [vmem:[#allocation3 + $0x688] ss:$16 sps:$4 sm:$0xff]  }
 0x167   :  { %2255 = vmatpush1.bf16.msra.mxu0 %v3499_v47  ;;  %v3585_v47 = vld [vmem:[#allocation3 + $0x6a4] ss:$16 sps:$4 sm:$0xff]  }
 0x168   :  { %2419 = vmatpush1.bf16.msra.mxu1 %v3502_v48  ;;  %2256 = vmatprep.subr.bf16.mxu0 %v3507_v49  ;;  %v3588_v48 = vld [vmem:[#allocation3 + $0x6ac] ss:$16 sps:$4 sm:$0xff]   ;;  %v3583_v49 = vld [vmem:[#allocation3 + $0x6a0] ss:$16 sps:$4 sm:$0xff]  }
 0x169   :  { %2420 = vmatprep.subr.bf16.mxu1 %v3510_v50  ;;  %v3586_v50 = vld [vmem:[#allocation3 + $0x6a8] ss:$16 sps:$4 sm:$0xff]  }
 0x16b   :  { %2257 = vmatpush1.bf16.msra.mxu0 %v3505_v51  ;;  %v3591_v51 = vld [vmem:[#allocation3 + $0x6c4] ss:$16 sps:$4 sm:$0xff]  }
 0x16c   :  { %2421 = vmatpush1.bf16.msra.mxu1 %v3508_v52  ;;  %2258 = vmatprep.subr.bf16.mxu0 %v3513_v54  ;;  %v3594_v52 = vld [vmem:[#allocation3 + $0x6cc] ss:$16 sps:$4 sm:$0xff]   ;;  %v3589_v54 = vld [vmem:[#allocation3 + $0x6c0] ss:$16 sps:$4 sm:$0xff]  }
 0x16d   :  { %2422 = vmatprep.subr.bf16.mxu1 %v3516_v55  ;;  %v3592_v55 = vld [vmem:[#allocation3 + $0x6c8] ss:$16 sps:$4 sm:$0xff]  }
 0x16f   :  { %2259 = vmatpush1.bf16.msra.mxu0 %v3511_v56  ;;  %v3597_v56 = vld [vmem:[#allocation3 + $0x6e4] ss:$16 sps:$4 sm:$0xff]  }
 0x170   :  { %2423 = vmatpush1.bf16.msra.mxu1 %v3514_v58  ;;  %2260 = vmatprep.subr.bf16.mxu0 %v3519_v59  ;;  %v3600_v58 = vld [vmem:[#allocation3 + $0x6ec] ss:$16 sps:$4 sm:$0xff]   ;;  %v3595_v59 = vld [vmem:[#allocation3 + $0x6e0] ss:$16 sps:$4 sm:$0xff]  }
 0x171   :  { %2424 = vmatprep.subr.bf16.mxu1 %v3522_v63  ;;  %v3598_v63 = vld [vmem:[#allocation3 + $0x6e8] ss:$16 sps:$4 sm:$0xff]  }
 0x173   :  { %2261 = vmatpush1.bf16.msra.mxu0 %v3517_v0  ;;  %v3603_v0 = vld [vmem:[#allocation3 + $0x704] ss:$16 sps:$4 sm:$0xff]  }
 0x174   :  { %2425 = vmatpush1.bf16.msra.mxu1 %v3520_v3  ;;  %2262 = vmatprep.subr.bf16.mxu0 %v3525_v4  ;;  %v3606_v3 = vld [vmem:[#allocation3 + $0x70c] ss:$16 sps:$4 sm:$0xff]   ;;  %v3601_v4 = vld [vmem:[#allocation3 + $0x700] ss:$16 sps:$4 sm:$0xff]  }
 0x175   :  { %2426 = vmatprep.subr.bf16.mxu1 %v3528_v5  ;;  %v3604_v5 = vld [vmem:[#allocation3 + $0x708] ss:$16 sps:$4 sm:$0xff]  }
 0x177   :  { %2263 = vmatpush1.bf16.msra.mxu0 %v3523_v6  ;;  %v3609_v6 = vld [vmem:[#allocation3 + $0x724] ss:$16 sps:$4 sm:$0xff]  }
 0x178   :  { %2427 = vmatpush1.bf16.msra.mxu1 %v3526_v7  ;;  %2264 = vmatprep.subr.bf16.mxu0 %v3531_v61  ;;  %v3612_v7 = vld [vmem:[#allocation3 + $0x72c] ss:$16 sps:$4 sm:$0xff]   ;;  %v3607_v61 = vld [vmem:[#allocation3 + $0x720] ss:$16 sps:$4 sm:$0xff]  }
 0x179   :  { %2428 = vmatprep.subr.bf16.mxu1 %v3534_v8  ;;  %v3610_v8 = vld [vmem:[#allocation3 + $0x728] ss:$16 sps:$4 sm:$0xff]  }
 0x17b   :  { %2265 = vmatpush1.bf16.msra.mxu0 %v3529_v9  ;;  %v3615_v9 = vld [vmem:[#allocation3 + $0x744] ss:$16 sps:$4 sm:$0xff]  }
 0x17c   :  { %2429 = vmatpush1.bf16.msra.mxu1 %v3532_v62  ;;  %2266 = vmatprep.subr.bf16.mxu0 %v3537_v10  ;;  %v3618_v62 = vld [vmem:[#allocation3 + $0x74c] ss:$16 sps:$4 sm:$0xff]   ;;  %v3613_v10 = vld [vmem:[#allocation3 + $0x740] ss:$16 sps:$4 sm:$0xff]  }
 0x17d   :  { %2430 = vmatprep.subr.bf16.mxu1 %v3540_v12  ;;  %v3616_v12 = vld [vmem:[#allocation3 + $0x748] ss:$16 sps:$4 sm:$0xff]  }
 0x17f   :  { %2267 = vmatpush1.bf16.msra.mxu0 %v3535_v13  ;;  %v3621_v13 = vld [vmem:[#allocation3 + $0x764] ss:$16 sps:$4 sm:$0xff]  }
 0x180   :  { %2431 = vmatpush1.bf16.msra.mxu1 %v3538_v14  ;;  %2268 = vmatprep.subr.bf16.mxu0 %v3543_v17  ;;  %v3624_v14 = vld [vmem:[#allocation3 + $0x76c] ss:$16 sps:$4 sm:$0xff]   ;;  %v3619_v17 = vld [vmem:[#allocation3 + $0x760] ss:$16 sps:$4 sm:$0xff]  }
 0x181   :  { %2432 = vmatprep.subr.bf16.mxu1 %v3546_v18  ;;  %v3622_v18 = vld [vmem:[#allocation3 + $0x768] ss:$16 sps:$4 sm:$0xff]  }
 0x183   :  { %2269 = vmatpush1.bf16.msra.mxu0 %v3541_v20  ;;  %v3627_v20 = vld [vmem:[#allocation3 + $0x784] ss:$16 sps:$4 sm:$0xff]  }
 0x184   :  { %2433 = vmatpush1.bf16.msra.mxu1 %v3544_v21  ;;  %2270 = vmatprep.subr.bf16.mxu0 %v3549_v1  ;;  %v3630_v21 = vld [vmem:[#allocation3 + $0x78c] ss:$16 sps:$4 sm:$0xff]   ;;  %v3625_v1 = vld [vmem:[#allocation3 + $0x780] ss:$16 sps:$4 sm:$0xff]  }
 0x185   :  { %2434 = vmatprep.subr.bf16.mxu1 %v3552_v22  ;;  %v3628_v22 = vld [vmem:[#allocation3 + $0x788] ss:$16 sps:$4 sm:$0xff]  }
 0x187   :  { %2271 = vmatpush1.bf16.msra.mxu0 %v3547_v46  ;;  %v3633_v46 = vld [vmem:[#allocation3 + $0x7a4] ss:$16 sps:$4 sm:$0xff]  }
 0x188   :  { %2435 = vmatpush1.bf16.msra.mxu1 %v3550_v25  ;;  %2281 = vmatprep.subr.bf16.mxu0 %v3555_v60  ;;  %v3631_v25 = vld [vmem:[#allocation3 + $0x7a0] ss:$16 sps:$4 sm:$0xff]   ;;  %v3634_v60 = vld [vmem:[#allocation3 + $0x7a8] ss:$16 sps:$4 sm:$0xff]  }
 0x189   :  { %2445 = vmatprep.subr.bf16.mxu1 %v3558_v2  ;;  %v3639_v2 = vld [vmem:[#allocation3 + $0x7c4] ss:$16 sps:$4 sm:$0xff]  }
 0x18a   :  { %2273 = vmatmul.mubr.bf16.vlgmr.msra.gmra.mrb[16].mxu0 %v596_v29 }
 0x18b   :  { %2437 = vmatmul.mubr.bf16.vlgmr.msra.gmra.mrb[16].mxu1 %v596_v29  ;;  %2282 = vmatpush1.bf16.msra.mxu0 %v3553_v28  ;;  %v3637_v28 = vld [vmem:[#allocation3 + $0x7c0] ss:$16 sps:$4 sm:$0xff]   ;;  %v3640_v29 = vld [vmem:[#allocation3 + $0x7c8] ss:$16 sps:$4 sm:$0xff]  }
 0x18c   :  { %2313 = vmatprep.mubr.bf16.mxu0 %v599_v32  ;;  %2446 = vmatpush1.bf16.msra.mxu1 %v3556_v30  ;;  %v3645_v30 = vld [vmem:[#allocation3 + $0x7e4] ss:$16 sps:$4 sm:$0xff]  }
 0x18d   :  { %2477 = vmatprep.mubr.bf16.mxu1 %v599_v32  ;;  %2283 = vmatprep.subr.bf16.mxu0 %v3561_v31  ;;  %v3648_v31 = vld [vmem:[#allocation3 + $0x7ec] ss:$16 sps:$4 sm:$0xff]   ;;  %v3643_v32 = vld [vmem:[#allocation3 + $0x7e0] ss:$16 sps:$4 sm:$0xff]  }
 0x18e   :  { %2447 = vmatprep.subr.bf16.mxu1 %v3564_v33  ;;  %v590_v33 = vmax.f32 %v3898_v11, 0.0  ;;  %v3652_v11 = vld [vmem:[%s4025_s7 + $0x80] sm:$0xff]  }
 0x18f   :  { %2284 = vmatpush1.bf16.msra.mxu0 %v3559_v57  ;;  %v3646_v57 = vld [vmem:[#allocation3 + $0x7e8] ss:$16 sps:$4 sm:$0xff]  }
 0x190   :  { %2448 = vmatpush1.bf16.msra.mxu1 %v3562_v34  ;;  %2285 = vmatprep.subr.bf16.mxu0 %v3567_v35  ;;  %v3649_v34 = vld [vmem:[%s4025_s7 + $0x40] sm:$0xff]  }
 0x191   :  { %2449 = vmatprep.subr.bf16.mxu1 %v3570_v19  ;;  %v3650_v35 = vld [vmem:[%s4025_s7 + $0xc0] sm:$0xff]  }
 0x192   :  { %v3651_v19 = vld [vmem:[%s4025_s7] sm:$0xff]  }
 0x193   :  { %2286 = vmatpush1.bf16.msra.mxu0 %v3565_v36  ;;  %v598_v36 = vpack.c.bf16 %v590_v33, %v590_v33 }
 0x194   :  { %2450 = vmatpush1.bf16.msra.mxu1 %v3568_v37  ;;  %2287 = vmatprep.subr.bf16.mxu0 %v3573_v38  ;;  %v3653_v37 = vld [vmem:[%s4025_s7 + $0x48] sm:$0xff]  }
 0x195   :  { %2451 = vmatprep.subr.bf16.mxu1 %v3576_v39  ;;  %v3654_v38 = vld [vmem:[%s4025_s7 + $0xc8] sm:$0xff]  }
 0x196   :  { %v3655_v39 = vld [vmem:[%s4025_s7 + $0x8] sm:$0xff]  }
 0x197   :  { %2288 = vmatpush1.bf16.msra.mxu0 %v3571_v40  ;;  %v3656_v40 = vld [vmem:[%s4025_s7 + $0x88] sm:$0xff]  }
 0x198   :  { %2452 = vmatpush1.bf16.msra.mxu1 %v3574_v41  ;;  %2289 = vmatprep.subr.bf16.mxu0 %v3579_v42  ;;  %v3657_v41 = vld [vmem:[%s4025_s7 + $0x50] sm:$0xff]  }
 0x199   :  { %2453 = vmatprep.subr.bf16.mxu1 %v3582_v43  ;;  %v3658_v42 = vld [vmem:[%s4025_s7 + $0xd0] sm:$0xff]  }
 0x19a   :  { %v3659_v43 = vld [vmem:[%s4025_s7 + $0x10] sm:$0xff]  }
 0x19b   :  { %2290 = vmatpush1.bf16.msra.mxu0 %v3577_v44  ;;  %v3660_v44 = vld [vmem:[%s4025_s7 + $0x90] sm:$0xff]  }
 0x19c   :  { %2454 = vmatpush1.bf16.msra.mxu1 %v3580_v45  ;;  %2291 = vmatprep.subr.bf16.mxu0 %v3585_v47  ;;  %v3661_v45 = vld [vmem:[%s4025_s7 + $0x58] sm:$0xff]  }
 0x19d   :  { %2455 = vmatprep.subr.bf16.mxu1 %v3588_v48  ;;  %v3662_v47 = vld [vmem:[%s4025_s7 + $0xd8] sm:$0xff]  }
 0x19e   :  { %v3663_v48 = vld [vmem:[%s4025_s7 + $0x18] sm:$0xff]  }
 0x19f   :  { %2292 = vmatpush1.bf16.msra.mxu0 %v3583_v49  ;;  %v3664_v49 = vld [vmem:[%s4025_s7 + $0x98] sm:$0xff]  }
 0x1a0   :  { %2456 = vmatpush1.bf16.msra.mxu1 %v3586_v50  ;;  %2293 = vmatprep.subr.bf16.mxu0 %v3591_v51  ;;  %v3665_v50 = vld [vmem:[%s4025_s7 + $0x60] sm:$0xff]  }
 0x1a1   :  { %2457 = vmatprep.subr.bf16.mxu1 %v3594_v52  ;;  %v3666_v51 = vld [vmem:[%s4025_s7 + $0xe0] sm:$0xff]  }
 0x1a2   :  { %v3667_v52 = vld [vmem:[%s4025_s7 + $0x20] sm:$0xff]  }
 0x1a3   :  { %2294 = vmatpush1.bf16.msra.mxu0 %v3589_v54  ;;  %v3668_v54 = vld [vmem:[%s4025_s7 + $0xa0] sm:$0xff]  }
 0x1a4   :  { %2458 = vmatpush1.bf16.msra.mxu1 %v3592_v55  ;;  %2295 = vmatprep.subr.bf16.mxu0 %v3597_v56  ;;  %v3669_v55 = vld [vmem:[%s4025_s7 + $0x68] sm:$0xff]  }
 0x1a5   :  { %2459 = vmatprep.subr.bf16.mxu1 %v3600_v58  ;;  %v3670_v56 = vld [vmem:[%s4025_s7 + $0xe8] sm:$0xff]  }
 0x1a6   :  { %v3671_v58 = vld [vmem:[%s4025_s7 + $0x28] sm:$0xff]  }
 0x1a7   :  { %2296 = vmatpush1.bf16.msra.mxu0 %v3595_v59  ;;  %v3672_v59 = vld [vmem:[%s4025_s7 + $0xa8] sm:$0xff]  }
 0x1a8   :  { %2460 = vmatpush1.bf16.msra.mxu1 %v3598_v63  ;;  %2297 = vmatprep.subr.bf16.mxu0 %v3603_v0  ;;  %v3673_v63 = vld [vmem:[%s4025_s7 + $0x70] sm:$0xff]  }
 0x1a9   :  { %2461 = vmatprep.subr.bf16.mxu1 %v3606_v3  ;;  %v3674_v0 = vld [vmem:[%s4025_s7 + $0xf0] sm:$0xff]  }
 0x1aa   :  { %v3675_v3 = vld [vmem:[%s4025_s7 + $0x30] sm:$0xff]  }
 0x1ab   :  { %2298 = vmatpush1.bf16.msra.mxu0 %v3601_v4  ;;  %v3676_v4 = vld [vmem:[%s4025_s7 + $0xb0] sm:$0xff]  }
 0x1ac   :  { %2462 = vmatpush1.bf16.msra.mxu1 %v3604_v5  ;;  %2299 = vmatprep.subr.bf16.mxu0 %v3609_v6  ;;  %v3677_v5 = vld [vmem:[%s4025_s7 + $0x78] sm:$0xff]  }
 0x1ad   :  { %2463 = vmatprep.subr.bf16.mxu1 %v3612_v7  ;;  %v3678_v6 = vld [vmem:[%s4025_s7 + $0xf8] sm:$0xff]  }
 0x1ae   :  { %v3679_v7 = vld [vmem:[%s4025_s7 + $0x38] sm:$0xff]  }
 0x1af   :  { %2300 = vmatpush1.bf16.msra.mxu0 %v3607_v61  ;;  %v3680_v61 = vld [vmem:[%s4025_s7 + $0xb8] sm:$0xff]  }
 0x1b0   :  { %2464 = vmatpush1.bf16.msra.mxu1 %v3610_v8  ;;  %2301 = vmatprep.subr.bf16.mxu0 %v3615_v9  ;;  %v856_v8 = vld [vmem:[%s4024_s6] sm:$0xf] }
 0x1b1   :  { %2465 = vmatprep.subr.bf16.mxu1 %v3618_v62  ;;  %v861_v9 = vrot.slane %v856_v8, %v538_v15  ;;  %v869_v62 = vrot.slane %v856_v8, %v546_v24 }
 0x1b3   :  { %2302 = vmatpush1.bf16.msra.mxu0 %v3613_v10  ;;  %v865_v10 = vrot.slane %v856_v8, %v542_v16 }
 0x1b4   :  { %2466 = vmatpush1.bf16.msra.mxu1 %v3616_v12  ;;  %2303 = vmatprep.subr.bf16.mxu0 %v3621_v13  ;;  %v873_v12 = vrot.slane %v856_v8, %v550_v27 }
 0x1b5   :  { %2467 = vmatprep.subr.bf16.mxu1 %v3624_v14 }
 0x1b7   :  { %2304 = vmatpush1.bf16.msra.mxu0 %v3619_v17 }
 0x1b8   :  { %2468 = vmatpush1.bf16.msra.mxu1 %v3622_v18  ;;  %2305 = vmatprep.subr.bf16.mxu0 %v3627_v20 }
 0x1b9   :  { %2469 = vmatprep.subr.bf16.mxu1 %v3630_v21 }
 0x1bb   :  { %2306 = vmatpush1.bf16.msra.mxu0 %v3625_v1 }
 0x1bc   :  { %2470 = vmatpush1.bf16.msra.mxu1 %v3628_v22  ;;  %2307 = vmatprep.subr.bf16.mxu0 %v3633_v46 }
 0x1bd   :  { %2471 = vmatprep.subr.bf16.mxu1 %v3636_v23 }
 0x1bf   :  { %2308 = vmatpush1.bf16.msra.mxu0 %v3631_v25 }
 0x1c0   :  { %2472 = vmatpush1.bf16.msra.mxu1 %v3634_v60  ;;  %2309 = vmatprep.subr.bf16.mxu0 %v3639_v2 }
 0x1c1   :  { %2473 = vmatprep.subr.bf16.mxu1 %v3642_v26 }
 0x1c3   :  { %2310 = vmatpush1.bf16.msra.mxu0 %v3637_v28 }
 0x1c4   :  { %2474 = vmatpush1.bf16.msra.mxu1 %v3640_v29  ;;  %2311 = vmatprep.subr.bf16.mxu0 %v3645_v30 }
 0x1c5   :  { %2475 = vmatprep.subr.bf16.mxu1 %v3648_v31  ;;  %v3140_v31 = vld [vmem:[#allocation2] ss:$0 sm:$0xff] }
 0x1c7   :  { %2312 = vmatpush1.bf16.msra.mxu0 %v3643_v32 }
 0x1c8   :  { %2476 = vmatpush1.bf16.msra.mxu1 %v3646_v57  ;;  %3173 = vmatprep.subr.bf16.mxu0 %v3649_v34 }
 0x1c9   :  { %3195 = vmatprep.subr.bf16.mxu1 %v3650_v35 }
 0x1ca   :  { %2314 = vmatmul.mubr.bf16.vlgmr.msra.gmra.mrb[16].mxu0 %v598_v36 }
 0x1cb   :  { %2478 = vmatmul.mubr.bf16.vlgmr.msra.gmra.mrb[16].mxu1 %v598_v36  ;;  %3174 = vmatpush3.bf16.msra.mxu0 %v3651_v19 }
 0x1cc   :  { %3196 = vmatpush3.bf16.msra.mxu1 %v3652_v11  ;;  %3175 = vmatprep.subr.bf16.mxu0 %v3653_v37 }
 0x1cd   :  { %3197 = vmatprep.subr.bf16.mxu1 %v3654_v38 }
 0x1cf   :  { %3176 = vmatpush3.bf16.msra.mxu0 %v3655_v39 }
 0x1d0   :  { %3198 = vmatpush3.bf16.msra.mxu1 %v3656_v40  ;;  %3177 = vmatprep.subr.bf16.mxu0 %v3657_v41 }
 0x1d1   :  { %3199 = vmatprep.subr.bf16.mxu1 %v3658_v42 }
 0x1d3   :  { %3178 = vmatpush3.bf16.msra.mxu0 %v3659_v43 }
 0x1d4   :  { %3200 = vmatpush3.bf16.msra.mxu1 %v3660_v44  ;;  %3179 = vmatprep.subr.bf16.mxu0 %v3661_v45 }
 0x1d5   :  { %3201 = vmatprep.subr.bf16.mxu1 %v3662_v47 }
 0x1d7   :  { %3180 = vmatpush3.bf16.msra.mxu0 %v3663_v48 }
 0x1d8   :  { %3202 = vmatpush3.bf16.msra.mxu1 %v3664_v49  ;;  %3181 = vmatprep.subr.bf16.mxu0 %v3665_v50 }
 0x1d9   :  { %3203 = vmatprep.subr.bf16.mxu1 %v3666_v51 }
 0x1db   :  { %3182 = vmatpush3.bf16.msra.mxu0 %v3667_v52 }
 0x1dc   :  { %3204 = vmatpush3.bf16.msra.mxu1 %v3668_v54  ;;  %3183 = vmatprep.subr.bf16.mxu0 %v3669_v55 }
 0x1dd   :  { %3205 = vmatprep.subr.bf16.mxu1 %v3670_v56 }
 0x1df   :  { %3184 = vmatpush3.bf16.msra.mxu0 %v3671_v58 }
 0x1e0   :  { %3206 = vmatpush3.bf16.msra.mxu1 %v3672_v59  ;;  %3185 = vmatprep.subr.bf16.mxu0 %v3673_v63 }
 0x1e1   :  { %3207 = vmatprep.subr.bf16.mxu1 %v3674_v0 }
 0x1e3   :  { %3186 = vmatpush3.bf16.msra.mxu0 %v3675_v3 }
 0x1e4   :  { %3208 = vmatpush3.bf16.msra.mxu1 %v3676_v4  ;;  %3187 = vmatprep.subr.bf16.mxu0 %v3677_v5 }
 0x1e5   :  { %3209 = vmatprep.subr.bf16.mxu1 %v3678_v6 }
 0x1e7   :  { %3188 = vmatpush3.bf16.msra.mxu0 %v3679_v7 }
 0x1e8   :  { %3210 = vmatpush3.bf16.msra.mxu1 %v3680_v61 }
 0x29d   :  { %v2315_v13 = vpop.f32.mrb[16].mxu0 }
 0x29e   :  { %v3217_v14 = vadd.f32 %v2315_v13, %v861_v9  ;;  %v2479_v17 = vpop.f32.mrb[16].mxu1  ;;  %v2317_v18 = vpop.f32.mrb[17].mxu0 }
 0x29f   :  { %v3219_v20 = vadd.f32 %v2479_v17, %v869_v62  ;;  %v3218_v21 = vadd.f32 %v2317_v18, %v865_v10  ;;  %v2481_v1 = vpop.f32.mrb[17].mxu1  ;;  %v2319_v22 = vpop.f32.mrb[18].mxu0 }
 0x2a0   :  { %v2486_v46 = vmax.f32 %v3217_v14, 0.0  ;;  %v3220_v23 = vadd.f32 %v2481_v1, %v873_v12  ;;  %v2483_v15 = vpop.f32.mrb[18].mxu1  ;;  %v2320_v25 = vpop.f32.mrb[19].mxu0 }
 0x2a1   :  { %v2488_v60 = vmax.f32 %v3219_v20, 0.0  ;;  %v2487_v24 = vmax.f32 %v3218_v21, 0.0  ;;  %v2484_v2 = vpop.f32.mrb[19].mxu1 }
 0x2a2   :  { %v2489_v26 = vmax.f32 %v3220_v23, 0.0  ;;  %v2490_v28 = vpack.c.bf16 %v2486_v46, %v2486_v46 }
 0x2a3   :  { %v2491_v16 = vpack.c.bf16 %v2487_v24, %v2487_v24  ;;  %v2492_v27 = vpack.c.bf16 %v2488_v60, %v2488_v60 }
 0x2a4   :  { %v2493_v53 = vpack.c.bf16 %v2489_v26, %v2489_v26 }
 0x2a5   :  { %2789 = vmatprep.mubr.bf16.mxu0 %v2491_v16 }
 0x2a6   :  { %2829 = vmatprep.mubr.bf16.mxu1 %v2493_v53  ;;  %2790 = vmatmul.mubr.bf16.vlgmr.msra.gmra.mrb[20].mxu0 %v2490_v28 }
 0x2a7   :  { %2830 = vmatmul.mubr.bf16.vlgmr.msra.gmra.mrb[20].mxu1 %v2492_v27 }
 0x379   :  { %v3189_v29 = vpop.f32.mrb[20].mxu0 }
 0x37a   :  { %v3211_v30 = vpop.f32.mrb[20].mxu1  ;;  %v3190_v32 = vpop.f32.mrb[21].mxu0 }
 0x37b   :  { %v3191_v33 = vadd.f32 %v3190_v32, %v3189_v29  ;;  %v3212_v57 = vpop.f32.mrb[21].mxu1  ;;  %v3192_v34 = vpop.f32.mrb[22].mxu0 }
 0x37c   :  { %v3213_v35 = vadd.f32 %v3212_v57, %v3211_v30  ;;  %v3214_v19 = vpop.f32.mrb[22].mxu1  ;;  %v3193_v36 = vpop.f32.mrb[23].mxu0 }
 0x37d   :  { %v2792_v11 = vadd.f32 %v3191_v33, %v3140_v31  ;;  %v3215_v37 = vpop.f32.mrb[23].mxu1 }
 0x37f   :  { %v2832_v38 = vadd.f32 %v3213_v35, %v2792_v11 }
 0x381   :  { %2838 = vst.msk [vmem:[%s4027_s9] sm:$0xff] %vm2837_vm3, %v2832_v38 }
 0x382   :  { %2843 = vsyncpa [#allocation4], 1 }

</bundles_post_ra>
